<compile_context>
chip_gen: v6e
topology: v6e:2x2x1
jax: 0.10.0
libtpu: 0.0.40
codegen_flags: <defaults>
</compile_context>

<pallas_src>
import jax
import jax.numpy as jnp
from jax.experimental import pallas as pl
from jax.experimental.pallas import tpu as pltpu


def lstm_kernel(x_ref, w_ih_ref, w_hh_ref, b_ref, w_fc_ref, b_fc_ref,
                out_ref, xg_scr):
    seq_len = x_ref.shape[0]
    hp = w_hh_ref.shape[0]          # padded hidden size (multiple of 128)

    # Batched input projection for all timesteps in one MXU matmul:
    # (seq_len, in) @ (in, 4*Hp) + b  ->  VMEM scratch.
    xg_scr[...] = (jnp.dot(x_ref[...], w_ih_ref[...],
                           preferred_element_type=jnp.float32)
                   + b_ref[...])

    def step(t, carry):
        h, c = carry
        # Only the serial, carried part stays in the loop: h @ W_hh (M = 1).
        gates = (xg_scr[pl.ds(t, 1), :]
                 + jnp.dot(h, w_hh_ref[...],
                           preferred_element_type=jnp.float32))
        # Lane-aligned full-vreg gate slices (each gate padded to hp lanes).
        i_g = jax.nn.sigmoid(gates[:, 0 * hp:1 * hp])
        f_g = jax.nn.sigmoid(gates[:, 1 * hp:2 * hp])
        g_g = jnp.tanh(gates[:, 2 * hp:3 * hp])
        o_g = jax.nn.sigmoid(gates[:, 3 * hp:4 * hp])
        c_new = f_g * c + i_g * g_g
        h_new = o_g * jnp.tanh(c_new)
        return h_new, c_new

    h0 = jnp.zeros((1, hp), jnp.float32)
    c0 = jnp.zeros((1, hp), jnp.float32)
    h_t, _ = jax.lax.fori_loop(0, seq_len, step, (h0, c0), unroll=True)

    # FC head on the last hidden state (== out[-1] of the PyTorch module).
    out_ref[...] = (jnp.dot(h_t, w_fc_ref[...],
                            preferred_element_type=jnp.float32)
                    + b_fc_ref[...])


def lstm_forward(x, w_ih, w_hh, b_ih, b_hh, w_fc, b_fc):
    """x: (seq_len, input_size). Weights in PyTorch layout:
       w_ih (4H, in), w_hh (4H, H), b_ih/b_hh (4H,), w_fc (out, H), b_fc (out,).
       Returns (output_size,) = fc(h_T), matching `out[-1]` of the module."""
    seq_len, input_size = x.shape
    h4 = w_ih.shape[0]
    hidden = h4 // 4
    out_size = w_fc.shape[0]

    # Pad each gate's hidden width to a multiple of 128 lanes so in-kernel gate
    # slices are full-vreg and the recurrent matmul shapes are lane-aligned.
    lanes = 128
    hp = ((hidden + lanes - 1) // lanes) * lanes

    def pad_gate_cols(w_t):  # (rows, 4H) -> (rows, 4*hp), zero pad per gate
        rows = w_t.shape[0]
        return jnp.pad(w_t.reshape(rows, 4, hidden),
                       ((0, 0), (0, 0), (0, hp - hidden))).reshape(rows, 4 * hp)

    w_ih_p = pad_gate_cols(jnp.transpose(w_ih).astype(jnp.float32))      # (in, 4hp)
    w_hh_p = jnp.pad(pad_gate_cols(jnp.transpose(w_hh).astype(jnp.float32)),
                     ((0, hp - hidden), (0, 0)))                          # (hp, 4hp)
    b_p = pad_gate_cols((b_ih + b_hh).reshape(1, 4 * hidden)
                        .astype(jnp.float32))                             # (1, 4hp)
    w_fc_p = jnp.pad(jnp.transpose(w_fc).astype(jnp.float32),
                     ((0, hp - hidden), (0, 0)))                          # (hp, out)
    b_fc2 = b_fc.reshape(1, out_size).astype(jnp.float32)                 # (1, out)

    vmem_spec = pl.BlockSpec(memory_space=pltpu.MemorySpace.VMEM)
    out = pl.pallas_call(
        lstm_kernel,
        out_shape=jax.ShapeDtypeStruct((1, out_size), jnp.float32),
        in_specs=[vmem_spec] * 6,
        out_specs=vmem_spec,
        scratch_shapes=[
            pltpu.VMEM((seq_len, 4 * hp), jnp.float32),  # precomputed x @ W_ih
        ],
    )(x.astype(jnp.float32), w_ih_p, w_hh_p, b_p, w_fc_p, b_fc2)
    return out[0]


def lstm_reference(x, w_ih, w_hh, b_ih, b_hh, w_fc, b_fc):
    """Pure-JAX reference mirroring torch.nn.LSTM + Linear semantics."""
    hidden = w_hh.shape[1]
    h = jnp.zeros((1, hidden), jnp.float32)
    c = jnp.zeros((1, hidden), jnp.float32)
    for t in range(x.shape[0]):
        x_t = x[t:t + 1]
        gates = x_t @ w_ih.T + h @ w_hh.T + (b_ih + b_hh)[None, :]
        i_g = jax.nn.sigmoid(gates[:, 0 * hidden:1 * hidden])
        f_g = jax.nn.sigmoid(gates[:, 1 * hidden:2 * hidden])
        g_g = jnp.tanh(gates[:, 2 * hidden:3 * hidden])
        o_g = jax.nn.sigmoid(gates[:, 3 * hidden:4 * hidden])
        c = f_g * c + i_g * g_g
        h = o_g * jnp.tanh(c)
    return (h @ w_fc.T + b_fc[None, :])[0]


if __name__ == "__main__":
    input_size, hidden_size, output_size = 16, 32, 8
    seq_len = 8

    key = jax.random.PRNGKey(0)
    ks = jax.random.split(key, 8)
    bound = 1.0 / jnp.sqrt(hidden_size)

    x = jax.random.normal(ks[0], (seq_len, input_size), jnp.float32)
    w_ih = jax.random.uniform(ks[1], (4 * hidden_size, input_size),
                              jnp.float32, -bound, bound)
    w_hh = jax.random.uniform(ks[2], (4 * hidden_size, hidden_size),
                              jnp.float32, -bound, bound)
    b_ih = jax.random.uniform(ks[3], (4 * hidden_size,), jnp.float32,
                              -bound, bound)
    b_hh = jax.random.uniform(ks[4], (4 * hidden_size,), jnp.float32,
                              -bound, bound)
    w_fc = jax.random.uniform(ks[5], (output_size, hidden_size), jnp.float32,
                              -bound, bound)
    b_fc = jax.random.uniform(ks[6], (output_size,), jnp.float32,
                              -bound, bound)

    out = lstm_forward(x, w_ih, w_hh, b_ih, b_hh, w_fc, b_fc)
    out = jax.block_until_ready(out)

    ref = lstm_reference(x, w_ih, w_hh, b_ih, b_hh, w_fc, b_fc)
    assert out.shape == (output_size,)
    assert jnp.allclose(out, ref, atol=1e-5, rtol=1e-5), (out, ref)

    print("KERNEL_OK")
</pallas_src>

<mosaic_0001>
module attributes {stable_mosaic.version = 11 : i64} {
  func.func @lstm_kernel(%arg0: memref<8x16xf32, #tpu.memory_space<vmem>>, %arg1: memref<16x512xf32, #tpu.memory_space<vmem>>, %arg2: memref<128x512xf32, #tpu.memory_space<vmem>>, %arg3: memref<1x512xf32, #tpu.memory_space<vmem>>, %arg4: memref<128x8xf32, #tpu.memory_space<vmem>>, %arg5: memref<1x8xf32, #tpu.memory_space<vmem>>, %arg6: memref<1x8xf32, #tpu.memory_space<vmem>>, %arg7: memref<8x512xf32, #tpu.memory_space<vmem>>) attributes {dimension_semantics = [], scalar_prefetch = 0 : i64, scratch_operands = 1 : i64, tpu.core_type = #tpu.core_type<tc>} {
    %c0 = arith.constant 0 : index
    %c0_0 = arith.constant 0 : index
    %0 = vector.load %arg0[%c0, %c0_0] : memref<8x16xf32, #tpu.memory_space<vmem>>, vector<8x16xf32>
    %c0_1 = arith.constant 0 : index
    %c0_2 = arith.constant 0 : index
    %1 = vector.load %arg1[%c0_1, %c0_2] : memref<16x512xf32, #tpu.memory_space<vmem>>, vector<16x512xf32>
    %cst = arith.constant dense<0.000000e+00> : vector<8x512xf32>
    %2 = tpu.matmul %0, %1, %cst {dimension_numbers = #tpu.dot_dimension_numbers<[1], [0], [0], [1], [0, 0, 1, 1], [], []>} : vector<8x16xf32>, vector<16x512xf32>, vector<8x512xf32> -> vector<8x512xf32>
    %c0_3 = arith.constant 0 : index
    %c0_4 = arith.constant 0 : index
    %3 = vector.load %arg3[%c0_3, %c0_4] : memref<1x512xf32, #tpu.memory_space<vmem>>, vector<1x512xf32>
    %4 = vector.broadcast %3 : vector<1x512xf32> to vector<8x512xf32>
    %5 = arith.addf %2, %4 : vector<8x512xf32>
    %c0_5 = arith.constant 0 : index
    %c0_6 = arith.constant 0 : index
    %6 = vector.load %arg7[%c0_5, %c0_6] : memref<8x512xf32, #tpu.memory_space<vmem>>, vector<8x512xf32>
    tpu.vector_store %arg7[%c0_5, %c0_6], %5 {strides = array<i32>} : memref<8x512xf32, #tpu.memory_space<vmem>>, vector<8x512xf32>,
    %cst_7 = arith.constant 0.000000e+00 : f32
    %7 = vector.broadcast %cst_7 : f32 to vector<1x128xf32>
    %cst_8 = arith.constant 0.000000e+00 : f32
    %8 = vector.broadcast %cst_8 : f32 to vector<1x128xf32>
    %c0_i32 = arith.constant 0 : i32
    %9 = arith.index_cast %c0_i32 : i32 to index
    %c0_9 = arith.constant 0 : index
    %10 = vector.load %arg7[%9, %c0_9] : memref<8x512xf32, #tpu.memory_space<vmem>>, vector<1x512xf32>
    %c0_10 = arith.constant 0 : index
    %c0_11 = arith.constant 0 : index
    %11 = vector.load %arg2[%c0_10, %c0_11] : memref<128x512xf32, #tpu.memory_space<vmem>>, vector<128x512xf32>
    %cst_12 = arith.constant dense<0.000000e+00> : vector<1x512xf32>
    %12 = tpu.matmul %7, %11, %cst_12 {dimension_numbers = #tpu.dot_dimension_numbers<[1], [0], [0], [1], [0, 0, 1, 1], [], []>} : vector<1x128xf32>, vector<128x512xf32>, vector<1x512xf32> -> vector<1x512xf32>
    %13 = arith.addf %10, %12 : vector<1x512xf32>
    %14 = vector.extract_strided_slice %13 {offsets = [0, 0], sizes = [1, 128], strides = [1, 1]} : vector<1x512xf32> to vector<1x128xf32>
    %15 = arith.negf %14 : vector<1x128xf32>
    %16 = math.exp %15 : vector<1x128xf32>
    %cst_13 = arith.constant 1.000000e+00 : f32
    %17 = vector.broadcast %cst_13 : f32 to vector<1x128xf32>
    %18 = arith.addf %17, %16 : vector<1x128xf32>
    %19 = arith.divf %17, %18 : vector<1x128xf32>
    %20 = vector.extract_strided_slice %13 {offsets = [0, 128], sizes = [1, 128], strides = [1, 1]} : vector<1x512xf32> to vector<1x128xf32>
    %21 = arith.negf %20 : vector<1x128xf32>
    %22 = math.exp %21 : vector<1x128xf32>
    %cst_14 = arith.constant 1.000000e+00 : f32
    %23 = vector.broadcast %cst_14 : f32 to vector<1x128xf32>
    %24 = arith.addf %23, %22 : vector<1x128xf32>
    %25 = arith.divf %23, %24 : vector<1x128xf32>
    %26 = vector.extract_strided_slice %13 {offsets = [0, 256], sizes = [1, 128], strides = [1, 1]} : vector<1x512xf32> to vector<1x128xf32>
    %27 = math.tanh %26 : vector<1x128xf32>
    %28 = vector.extract_strided_slice %13 {offsets = [0, 384], sizes = [1, 128], strides = [1, 1]} : vector<1x512xf32> to vector<1x128xf32>
    %29 = arith.negf %28 : vector<1x128xf32>
    %30 = math.exp %29 : vector<1x128xf32>
    %cst_15 = arith.constant 1.000000e+00 : f32
    %31 = vector.broadcast %cst_15 : f32 to vector<1x128xf32>
    %32 = arith.addf %31, %30 : vector<1x128xf32>
    %33 = arith.divf %31, %32 : vector<1x128xf32>
    %34 = arith.mulf %25, %8 : vector<1x128xf32>
    %35 = arith.mulf %19, %27 : vector<1x128xf32>
    %36 = arith.addf %34, %35 : vector<1x128xf32>
    %37 = math.tanh %36 : vector<1x128xf32>
    %38 = arith.mulf %33, %37 : vector<1x128xf32>
    %c1_i32 = arith.constant 1 : i32
    %39 = arith.index_cast %c1_i32 : i32 to index
    %c0_16 = arith.constant 0 : index
    %40 = vector.load %arg7[%39, %c0_16] : memref<8x512xf32, #tpu.memory_space<vmem>>, vector<1x512xf32>
    %c0_17 = arith.constant 0 : index
    %c0_18 = arith.constant 0 : index
    %41 = vector.load %arg2[%c0_17, %c0_18] : memref<128x512xf32, #tpu.memory_space<vmem>>, vector<128x512xf32>
    %cst_19 = arith.constant dense<0.000000e+00> : vector<1x512xf32>
    %42 = tpu.matmul %38, %41, %cst_19 {dimension_numbers = #tpu.dot_dimension_numbers<[1], [0], [0], [1], [0, 0, 1, 1], [], []>} : vector<1x128xf32>, vector<128x512xf32>, vector<1x512xf32> -> vector<1x512xf32>
    %43 = arith.addf %40, %42 : vector<1x512xf32>
    %44 = vector.extract_strided_slice %43 {offsets = [0, 0], sizes = [1, 128], strides = [1, 1]} : vector<1x512xf32> to vector<1x128xf32>
    %45 = arith.negf %44 : vector<1x128xf32>
    %46 = math.exp %45 : vector<1x128xf32>
    %cst_20 = arith.constant 1.000000e+00 : f32
    %47 = vector.broadcast %cst_20 : f32 to vector<1x128xf32>
    %48 = arith.addf %47, %46 : vector<1x128xf32>
    %49 = arith.divf %47, %48 : vector<1x128xf32>
    %50 = vector.extract_strided_slice %43 {offsets = [0, 128], sizes = [1, 128], strides = [1, 1]} : vector<1x512xf32> to vector<1x128xf32>
    %51 = arith.negf %50 : vector<1x128xf32>
    %52 = math.exp %51 : vector<1x128xf32>
    %cst_21 = arith.constant 1.000000e+00 : f32
    %53 = vector.broadcast %cst_21 : f32 to vector<1x128xf32>
    %54 = arith.addf %53, %52 : vector<1x128xf32>
    %55 = arith.divf %53, %54 : vector<1x128xf32>
    %56 = vector.extract_strided_slice %43 {offsets = [0, 256], sizes = [1, 128], strides = [1, 1]} : vector<1x512xf32> to vector<1x128xf32>
    %57 = math.tanh %56 : vector<1x128xf32>
    %58 = vector.extract_strided_slice %43 {offsets = [0, 384], sizes = [1, 128], strides = [1, 1]} : vector<1x512xf32> to vector<1x128xf32>
    %59 = arith.negf %58 : vector<1x128xf32>
    %60 = math.exp %59 : vector<1x128xf32>
    %cst_22 = arith.constant 1.000000e+00 : f32
    %61 = vector.broadcast %cst_22 : f32 to vector<1x128xf32>
    %62 = arith.addf %61, %60 : vector<1x128xf32>
    %63 = arith.divf %61, %62 : vector<1x128xf32>
    %64 = arith.mulf %55, %36 : vector<1x128xf32>
    %65 = arith.mulf %49, %57 : vector<1x128xf32>
    %66 = arith.addf %64, %65 : vector<1x128xf32>
    %67 = math.tanh %66 : vector<1x128xf32>
    %68 = arith.mulf %63, %67 : vector<1x128xf32>
    %c2_i32 = arith.constant 2 : i32
    %69 = arith.index_cast %c2_i32 : i32 to index
    %c0_23 = arith.constant 0 : index
    %70 = vector.load %arg7[%69, %c0_23] : memref<8x512xf32, #tpu.memory_space<vmem>>, vector<1x512xf32>
    %c0_24 = arith.constant 0 : index
    %c0_25 = arith.constant 0 : index
    %71 = vector.load %arg2[%c0_24, %c0_25] : memref<128x512xf32, #tpu.memory_space<vmem>>, vector<128x512xf32>
    %cst_26 = arith.constant dense<0.000000e+00> : vector<1x512xf32>
    %72 = tpu.matmul %68, %71, %cst_26 {dimension_numbers = #tpu.dot_dimension_numbers<[1], [0], [0], [1], [0, 0, 1, 1], [], []>} : vector<1x128xf32>, vector<128x512xf32>, vector<1x512xf32> -> vector<1x512xf32>
    %73 = arith.addf %70, %72 : vector<1x512xf32>
    %74 = vector.extract_strided_slice %73 {offsets = [0, 0], sizes = [1, 128], strides = [1, 1]} : vector<1x512xf32> to vector<1x128xf32>
    %75 = arith.negf %74 : vector<1x128xf32>
    %76 = math.exp %75 : vector<1x128xf32>
    %cst_27 = arith.constant 1.000000e+00 : f32
    %77 = vector.broadcast %cst_27 : f32 to vector<1x128xf32>
    %78 = arith.addf %77, %76 : vector<1x128xf32>
    %79 = arith.divf %77, %78 : vector<1x128xf32>
    %80 = vector.extract_strided_slice %73 {offsets = [0, 128], sizes = [1, 128], strides = [1, 1]} : vector<1x512xf32> to vector<1x128xf32>
    %81 = arith.negf %80 : vector<1x128xf32>
    %82 = math.exp %81 : vector<1x128xf32>
    %cst_28 = arith.constant 1.000000e+00 : f32
    %83 = vector.broadcast %cst_28 : f32 to vector<1x128xf32>
    %84 = arith.addf %83, %82 : vector<1x128xf32>
    %85 = arith.divf %83, %84 : vector<1x128xf32>
    %86 = vector.extract_strided_slice %73 {offsets = [0, 256], sizes = [1, 128], strides = [1, 1]} : vector<1x512xf32> to vector<1x128xf32>
    %87 = math.tanh %86 : vector<1x128xf32>
    %88 = vector.extract_strided_slice %73 {offsets = [0, 384], sizes = [1, 128], strides = [1, 1]} : vector<1x512xf32> to vector<1x128xf32>
    %89 = arith.negf %88 : vector<1x128xf32>
    %90 = math.exp %89 : vector<1x128xf32>
    %cst_29 = arith.constant 1.000000e+00 : f32
    %91 = vector.broadcast %cst_29 : f32 to vector<1x128xf32>
    %92 = arith.addf %91, %90 : vector<1x128xf32>
    %93 = arith.divf %91, %92 : vector<1x128xf32>
    %94 = arith.mulf %85, %66 : vector<1x128xf32>
    %95 = arith.mulf %79, %87 : vector<1x128xf32>
    %96 = arith.addf %94, %95 : vector<1x128xf32>
    %97 = math.tanh %96 : vector<1x128xf32>
    %98 = arith.mulf %93, %97 : vector<1x128xf32>
    %c3_i32 = arith.constant 3 : i32
    %99 = arith.index_cast %c3_i32 : i32 to index
    %c0_30 = arith.constant 0 : index
    %100 = vector.load %arg7[%99, %c0_30] : memref<8x512xf32, #tpu.memory_space<vmem>>, vector<1x512xf32>
    %c0_31 = arith.constant 0 : index
    %c0_32 = arith.constant 0 : index
    %101 = vector.load %arg2[%c0_31, %c0_32] : memref<128x512xf32, #tpu.memory_space<vmem>>, vector<128x512xf32>
    %cst_33 = arith.constant dense<0.000000e+00> : vector<1x512xf32>
    %102 = tpu.matmul %98, %101, %cst_33 {dimension_numbers = #tpu.dot_dimension_numbers<[1], [0], [0], [1], [0, 0, 1, 1], [], []>} : vector<1x128xf32>, vector<128x512xf32>, vector<1x512xf32> -> vector<1x512xf32>
    %103 = arith.addf %100, %102 : vector<1x512xf32>
    %104 = vector.extract_strided_slice %103 {offsets = [0, 0], sizes = [1, 128], strides = [1, 1]} : vector<1x512xf32> to vector<1x128xf32>
    %105 = arith.negf %104 : vector<1x128xf32>
    %106 = math.exp %105 : vector<1x128xf32>
    %cst_34 = arith.constant 1.000000e+00 : f32
    %107 = vector.broadcast %cst_34 : f32 to vector<1x128xf32>
    %108 = arith.addf %107, %106 : vector<1x128xf32>
    %109 = arith.divf %107, %108 : vector<1x128xf32>
    %110 = vector.extract_strided_slice %103 {offsets = [0, 128], sizes = [1, 128], strides = [1, 1]} : vector<1x512xf32> to vector<1x128xf32>
    %111 = arith.negf %110 : vector<1x128xf32>
    %112 = math.exp %111 : vector<1x128xf32>
    %cst_35 = arith.constant 1.000000e+00 : f32
    %113 = vector.broadcast %cst_35 : f32 to vector<1x128xf32>
    %114 = arith.addf %113, %112 : vector<1x128xf32>
    %115 = arith.divf %113, %114 : vector<1x128xf32>
    %116 = vector.extract_strided_slice %103 {offsets = [0, 256], sizes = [1, 128], strides = [1, 1]} : vector<1x512xf32> to vector<1x128xf32>
    %117 = math.tanh %116 : vector<1x128xf32>
    %118 = vector.extract_strided_slice %103 {offsets = [0, 384], sizes = [1, 128], strides = [1, 1]} : vector<1x512xf32> to vector<1x128xf32>
    %119 = arith.negf %118 : vector<1x128xf32>
    %120 = math.exp %119 : vector<1x128xf32>
    %cst_36 = arith.constant 1.000000e+00 : f32
    %121 = vector.broadcast %cst_36 : f32 to vector<1x128xf32>
    %122 = arith.addf %121, %120 : vector<1x128xf32>
    %123 = arith.divf %121, %122 : vector<1x128xf32>
    %124 = arith.mulf %115, %96 : vector<1x128xf32>
    %125 = arith.mulf %109, %117 : vector<1x128xf32>
    %126 = arith.addf %124, %125 : vector<1x128xf32>
    %127 = math.tanh %126 : vector<1x128xf32>
    %128 = arith.mulf %123, %127 : vector<1x128xf32>
    %c4_i32 = arith.constant 4 : i32
    %129 = arith.index_cast %c4_i32 : i32 to index
    %c0_37 = arith.constant 0 : index
    %130 = vector.load %arg7[%129, %c0_37] : memref<8x512xf32, #tpu.memory_space<vmem>>, vector<1x512xf32>
    %c0_38 = arith.constant 0 : index
    %c0_39 = arith.constant 0 : index
    %131 = vector.load %arg2[%c0_38, %c0_39] : memref<128x512xf32, #tpu.memory_space<vmem>>, vector<128x512xf32>
    %cst_40 = arith.constant dense<0.000000e+00> : vector<1x512xf32>
    %132 = tpu.matmul %128, %131, %cst_40 {dimension_numbers = #tpu.dot_dimension_numbers<[1], [0], [0], [1], [0, 0, 1, 1], [], []>} : vector<1x128xf32>, vector<128x512xf32>, vector<1x512xf32> -> vector<1x512xf32>
    %133 = arith.addf %130, %132 : vector<1x512xf32>
    %134 = vector.extract_strided_slice %133 {offsets = [0, 0], sizes = [1, 128], strides = [1, 1]} : vector<1x512xf32> to vector<1x128xf32>
    %135 = arith.negf %134 : vector<1x128xf32>
    %136 = math.exp %135 : vector<1x128xf32>
    %cst_41 = arith.constant 1.000000e+00 : f32
    %137 = vector.broadcast %cst_41 : f32 to vector<1x128xf32>
    %138 = arith.addf %137, %136 : vector<1x128xf32>
    %139 = arith.divf %137, %138 : vector<1x128xf32>
    %140 = vector.extract_strided_slice %133 {offsets = [0, 128], sizes = [1, 128], strides = [1, 1]} : vector<1x512xf32> to vector<1x128xf32>
    %141 = arith.negf %140 : vector<1x128xf32>
    %142 = math.exp %141 : vector<1x128xf32>
    %cst_42 = arith.constant 1.000000e+00 : f32
    %143 = vector.broadcast %cst_42 : f32 to vector<1x128xf32>
    %144 = arith.addf %143, %142 : vector<1x128xf32>
    %145 = arith.divf %143, %144 : vector<1x128xf32>
    %146 = vector.extract_strided_slice %133 {offsets = [0, 256], sizes = [1, 128], strides = [1, 1]} : vector<1x512xf32> to vector<1x128xf32>
    %147 = math.tanh %146 : vector<1x128xf32>
    %148 = vector.extract_strided_slice %133 {offsets = [0, 384], sizes = [1, 128], strides = [1, 1]} : vector<1x512xf32> to vector<1x128xf32>
    %149 = arith.negf %148 : vector<1x128xf32>
    %150 = math.exp %149 : vector<1x128xf32>
    %cst_43 = arith.constant 1.000000e+00 : f32
    %151 = vector.broadcast %cst_43 : f32 to vector<1x128xf32>
    %152 = arith.addf %151, %150 : vector<1x128xf32>
    %153 = arith.divf %151, %152 : vector<1x128xf32>
    %154 = arith.mulf %145, %126 : vector<1x128xf32>
    %155 = arith.mulf %139, %147 : vector<1x128xf32>
    %156 = arith.addf %154, %155 : vector<1x128xf32>
    %157 = math.tanh %156 : vector<1x128xf32>
    %158 = arith.mulf %153, %157 : vector<1x128xf32>
    %c5_i32 = arith.constant 5 : i32
    %159 = arith.index_cast %c5_i32 : i32 to index
    %c0_44 = arith.constant 0 : index
    %160 = vector.load %arg7[%159, %c0_44] : memref<8x512xf32, #tpu.memory_space<vmem>>, vector<1x512xf32>
    %c0_45 = arith.constant 0 : index
    %c0_46 = arith.constant 0 : index
    %161 = vector.load %arg2[%c0_45, %c0_46] : memref<128x512xf32, #tpu.memory_space<vmem>>, vector<128x512xf32>
    %cst_47 = arith.constant dense<0.000000e+00> : vector<1x512xf32>
    %162 = tpu.matmul %158, %161, %cst_47 {dimension_numbers = #tpu.dot_dimension_numbers<[1], [0], [0], [1], [0, 0, 1, 1], [], []>} : vector<1x128xf32>, vector<128x512xf32>, vector<1x512xf32> -> vector<1x512xf32>
    %163 = arith.addf %160, %162 : vector<1x512xf32>
    %164 = vector.extract_strided_slice %163 {offsets = [0, 0], sizes = [1, 128], strides = [1, 1]} : vector<1x512xf32> to vector<1x128xf32>
    %165 = arith.negf %164 : vector<1x128xf32>
    %166 = math.exp %165 : vector<1x128xf32>
    %cst_48 = arith.constant 1.000000e+00 : f32
    %167 = vector.broadcast %cst_48 : f32 to vector<1x128xf32>
    %168 = arith.addf %167, %166 : vector<1x128xf32>
    %169 = arith.divf %167, %168 : vector<1x128xf32>
    %170 = vector.extract_strided_slice %163 {offsets = [0, 128], sizes = [1, 128], strides = [1, 1]} : vector<1x512xf32> to vector<1x128xf32>
    %171 = arith.negf %170 : vector<1x128xf32>
    %172 = math.exp %171 : vector<1x128xf32>
    %cst_49 = arith.constant 1.000000e+00 : f32
    %173 = vector.broadcast %cst_49 : f32 to vector<1x128xf32>
    %174 = arith.addf %173, %172 : vector<1x128xf32>
    %175 = arith.divf %173, %174 : vector<1x128xf32>
    %176 = vector.extract_strided_slice %163 {offsets = [0, 256], sizes = [1, 128], strides = [1, 1]} : vector<1x512xf32> to vector<1x128xf32>
    %177 = math.tanh %176 : vector<1x128xf32>
    %178 = vector.extract_strided_slice %163 {offsets = [0, 384], sizes = [1, 128], strides = [1, 1]} : vector<1x512xf32> to vector<1x128xf32>
    %179 = arith.negf %178 : vector<1x128xf32>
    %180 = math.exp %179 : vector<1x128xf32>
    %cst_50 = arith.constant 1.000000e+00 : f32
    %181 = vector.broadcast %cst_50 : f32 to vector<1x128xf32>
    %182 = arith.addf %181, %180 : vector<1x128xf32>
    %183 = arith.divf %181, %182 : vector<1x128xf32>
    %184 = arith.mulf %175, %156 : vector<1x128xf32>
    %185 = arith.mulf %169, %177 : vector<1x128xf32>
    %186 = arith.addf %184, %185 : vector<1x128xf32>
    %187 = math.tanh %186 : vector<1x128xf32>
    %188 = arith.mulf %183, %187 : vector<1x128xf32>
    %c6_i32 = arith.constant 6 : i32
    %189 = arith.index_cast %c6_i32 : i32 to index
    %c0_51 = arith.constant 0 : index
    %190 = vector.load %arg7[%189, %c0_51] : memref<8x512xf32, #tpu.memory_space<vmem>>, vector<1x512xf32>
    %c0_52 = arith.constant 0 : index
    %c0_53 = arith.constant 0 : index
    %191 = vector.load %arg2[%c0_52, %c0_53] : memref<128x512xf32, #tpu.memory_space<vmem>>, vector<128x512xf32>
    %cst_54 = arith.constant dense<0.000000e+00> : vector<1x512xf32>
    %192 = tpu.matmul %188, %191, %cst_54 {dimension_numbers = #tpu.dot_dimension_numbers<[1], [0], [0], [1], [0, 0, 1, 1], [], []>} : vector<1x128xf32>, vector<128x512xf32>, vector<1x512xf32> -> vector<1x512xf32>
    %193 = arith.addf %190, %192 : vector<1x512xf32>
    %194 = vector.extract_strided_slice %193 {offsets = [0, 0], sizes = [1, 128], strides = [1, 1]} : vector<1x512xf32> to vector<1x128xf32>
    %195 = arith.negf %194 : vector<1x128xf32>
    %196 = math.exp %195 : vector<1x128xf32>
    %cst_55 = arith.constant 1.000000e+00 : f32
    %197 = vector.broadcast %cst_55 : f32 to vector<1x128xf32>
    %198 = arith.addf %197, %196 : vector<1x128xf32>
    %199 = arith.divf %197, %198 : vector<1x128xf32>
    %200 = vector.extract_strided_slice %193 {offsets = [0, 128], sizes = [1, 128], strides = [1, 1]} : vector<1x512xf32> to vector<1x128xf32>
    %201 = arith.negf %200 : vector<1x128xf32>
    %202 = math.exp %201 : vector<1x128xf32>
    %cst_56 = arith.constant 1.000000e+00 : f32
    %203 = vector.broadcast %cst_56 : f32 to vector<1x128xf32>
    %204 = arith.addf %203, %202 : vector<1x128xf32>
    %205 = arith.divf %203, %204 : vector<1x128xf32>
    %206 = vector.extract_strided_slice %193 {offsets = [0, 256], sizes = [1, 128], strides = [1, 1]} : vector<1x512xf32> to vector<1x128xf32>
    %207 = math.tanh %206 : vector<1x128xf32>
    %208 = vector.extract_strided_slice %193 {offsets = [0, 384], sizes = [1, 128], strides = [1, 1]} : vector<1x512xf32> to vector<1x128xf32>
    %209 = arith.negf %208 : vector<1x128xf32>
    %210 = math.exp %209 : vector<1x128xf32>
    %cst_57 = arith.constant 1.000000e+00 : f32
    %211 = vector.broadcast %cst_57 : f32 to vector<1x128xf32>
    %212 = arith.addf %211, %210 : vector<1x128xf32>
    %213 = arith.divf %211, %212 : vector<1x128xf32>
    %214 = arith.mulf %205, %186 : vector<1x128xf32>
    %215 = arith.mulf %199, %207 : vector<1x128xf32>
    %216 = arith.addf %214, %215 : vector<1x128xf32>
    %217 = math.tanh %216 : vector<1x128xf32>
    %218 = arith.mulf %213, %217 : vector<1x128xf32>
    %c7_i32 = arith.constant 7 : i32
    %219 = arith.index_cast %c7_i32 : i32 to index
    %c0_58 = arith.constant 0 : index
    %220 = vector.load %arg7[%219, %c0_58] : memref<8x512xf32, #tpu.memory_space<vmem>>, vector<1x512xf32>
    %c0_59 = arith.constant 0 : index
    %c0_60 = arith.constant 0 : index
    %221 = vector.load %arg2[%c0_59, %c0_60] : memref<128x512xf32, #tpu.memory_space<vmem>>, vector<128x512xf32>
    %cst_61 = arith.constant dense<0.000000e+00> : vector<1x512xf32>
    %222 = tpu.matmul %218, %221, %cst_61 {dimension_numbers = #tpu.dot_dimension_numbers<[1], [0], [0], [1], [0, 0, 1, 1], [], []>} : vector<1x128xf32>, vector<128x512xf32>, vector<1x512xf32> -> vector<1x512xf32>
    %223 = arith.addf %220, %222 : vector<1x512xf32>
    %224 = vector.extract_strided_slice %223 {offsets = [0, 0], sizes = [1, 128], strides = [1, 1]} : vector<1x512xf32> to vector<1x128xf32>
    %225 = arith.negf %224 : vector<1x128xf32>
    %226 = math.exp %225 : vector<1x128xf32>
    %cst_62 = arith.constant 1.000000e+00 : f32
    %227 = vector.broadcast %cst_62 : f32 to vector<1x128xf32>
    %228 = arith.addf %227, %226 : vector<1x128xf32>
    %229 = arith.divf %227, %228 : vector<1x128xf32>
    %230 = vector.extract_strided_slice %223 {offsets = [0, 128], sizes = [1, 128], strides = [1, 1]} : vector<1x512xf32> to vector<1x128xf32>
    %231 = arith.negf %230 : vector<1x128xf32>
    %232 = math.exp %231 : vector<1x128xf32>
    %cst_63 = arith.constant 1.000000e+00 : f32
    %233 = vector.broadcast %cst_63 : f32 to vector<1x128xf32>
    %234 = arith.addf %233, %232 : vector<1x128xf32>
    %235 = arith.divf %233, %234 : vector<1x128xf32>
    %236 = vector.extract_strided_slice %223 {offsets = [0, 256], sizes = [1, 128], strides = [1, 1]} : vector<1x512xf32> to vector<1x128xf32>
    %237 = math.tanh %236 : vector<1x128xf32>
    %238 = vector.extract_strided_slice %223 {offsets = [0, 384], sizes = [1, 128], strides = [1, 1]} : vector<1x512xf32> to vector<1x128xf32>
    %239 = arith.negf %238 : vector<1x128xf32>
    %240 = math.exp %239 : vector<1x128xf32>
    %cst_64 = arith.constant 1.000000e+00 : f32
    %241 = vector.broadcast %cst_64 : f32 to vector<1x128xf32>
    %242 = arith.addf %241, %240 : vector<1x128xf32>
    %243 = arith.divf %241, %242 : vector<1x128xf32>
    %244 = arith.mulf %235, %216 : vector<1x128xf32>
    %245 = arith.mulf %229, %237 : vector<1x128xf32>
    %246 = arith.addf %244, %245 : vector<1x128xf32>
    %247 = math.tanh %246 : vector<1x128xf32>
    %248 = arith.mulf %243, %247 : vector<1x128xf32>
    %c8_i32 = arith.constant 8 : i32
    %c0_65 = arith.constant 0 : index
    %c0_66 = arith.constant 0 : index
    %249 = vector.load %arg4[%c0_65, %c0_66] : memref<128x8xf32, #tpu.memory_space<vmem>>, vector<128x8xf32>
    %cst_67 = arith.constant dense<0.000000e+00> : vector<1x8xf32>
    %250 = tpu.matmul %248, %249, %cst_67 {dimension_numbers = #tpu.dot_dimension_numbers<[1], [0], [0], [1], [0, 0, 1, 1], [], []>} : vector<1x128xf32>, vector<128x8xf32>, vector<1x8xf32> -> vector<1x8xf32>
    %c0_68 = arith.constant 0 : index
    %c0_69 = arith.constant 0 : index
    %251 = vector.load %arg5[%c0_68, %c0_69] : memref<1x8xf32, #tpu.memory_space<vmem>>, vector<1x8xf32>
    %252 = arith.addf %250, %251 : vector<1x8xf32>
    %c0_70 = arith.constant 0 : index
    %c0_71 = arith.constant 0 : index
    %253 = vector.load %arg6[%c0_70, %c0_71] : memref<1x8xf32, #tpu.memory_space<vmem>>, vector<1x8xf32>
    tpu.vector_store %arg6[%c0_70, %c0_71], %252 {strides = array<i32>} : memref<1x8xf32, #tpu.memory_space<vmem>>, vector<1x8xf32>,
    return
  }
}

</mosaic_0001>

<bundles_post_ra>
// kernel: tpu_custom_call.1
= control target key start
LH: loop header
LB: loop body
LE: loop exit
PB: predicated region body
PF: predicated region fallthrough
CT: control target
= control target key end

     0   :  { %11 = vsyncpa [#allocation4], 0  ;;  %s3337_s0 = inlined_call_operand.vmem [shape: f32[8,16], index: 0, kind: input, shape index: {}]   ;;  %s3338_s1 = inlined_call_operand.vmem [shape: f32[16,512], index: 1, kind: input, shape index: {}]   ;;  %s3339_s2 = inlined_call_operand.hbm [shape: f32[128,512], index: 2, kind: input, shape index: {}]   ;;  %s3340_s3 = inlined_call_operand.vmem [shape: f32[1,512], index: 3, kind: input, shape index: {}]   ;;  %s3341_s4 = inlined_call_operand.vmem [shape: f32[128,8], index: 4, kind: input, shape index: {}]   ;;  %s3342_s5 = inlined_call_operand.vmem [shape: f32[1,8], index: 5, kind: input, shape index: {}]   ;;  %s3343_s6 = inlined_call_operand.hbm [shape: f32[1,8], index: 6, kind: output, shape index: {}]  }
   0x1   :  { %12 = vsyncpa [#allocation5], 0  ;;  %s2347_s21 = smov [#allocation3]  }
   0x2   :  { %s22_s22 = sshll.u32 %s2347_s21, 4  ;;  %s23_s22 = int_to_ptr.vmem [resolvable:$true] %s22_s22 }
   0x3   :  { %s2311_s23 = scalar_lea.vmem %s23_s22, 8192  ;;  %p2316_p1 = scmp.lt.s32.totalorder %s23_s22, %s23_s22 }
   0x4   :  { %p2312_p0 = scmp.ne.s32.totalorder %s23_s22, %s2311_s23  ;;  %p2317_p2 = scmp.lt.s32.totalorder %s2311_s23, %s2311_s23 }
   0x6   :  { %p2318_p3 = por %p2317_p2, %p2316_p1 }
   0x8   :  { %p2319_p4 = pnand %p2318_p3, %p2312_p0 }
   0xa   :  { %2322 = shalt.err (!%p2319_p4)
}
   0xb   :  { %s2348_s24 = smov 512   ;;  %s2349_s25 = smov 32  }
   0xc   :  { %28 = dma.hbm_to_vmem [thread:$0]  %s3339_s2, 8192, %s23_s22, [#allocation4], %s2348_s24, %s2348_s24, %s2349_s25  }
   0xd   :  { %2343 = dma.done.wait [#allocation4], 8192  }
   0xe   :  { %2344 = vsyncadd [#allocation4], 4294959104  ;;  %v3344_v0 = vmov 0.0   ;;  %v44_v1 = vld [vmem:[%s3338_s1 + $0x28] sm:$0xff]  ;;  %v43_v2 = vld [vmem:[%s3338_s1 + $0x20] sm:$0xff]  ;;  %vm69_vm0 = vcmask 130048  }
   0xf   :  { %137 = vmatprep.mubr.f32.mxu1 %v3344_v0  ;;  %348 = vmatprep.mubr.f32.mxu0 %v3344_v0  ;;  %v40_v3 = vld [vmem:[%s3338_s1 + $0x8] sm:$0xff]  ;;  %v39_v4 = vld [vmem:[%s3338_s1] sm:$0xff]  ;;  %v46_v6 = vld [vmem:[%s3338_s1 + $0x38] sm:$0xff]  ;;  %vm2352_vm1 = vmmov 0   ;;  %s2353_s25 = smov [#allocation6]   ;;  %vm2009_vm2 = vcmask 57344  }
  0x10   :  { %101 = vmatprep.subr.mxu1 %v44_v1  ;;  %v38_v5 = vld [vmem:[%s3337_s0] sm:$0xff]  ;;  %v2412_v7 = vld [vmem:[#allocation3 + $0x1e8] sm:$0xff]  ;;  %v45_v8 = vld [vmem:[%s3338_s1 + $0x30] sm:$0xff]  ;;  %s2017_s26 = sshll.u32 %s2353_s25, 4  ;;  %s2018_s26 = int_to_ptr.vmem [resolvable:$true] %s2017_s26 }
  0x11   :  { %102 = vmatpush1.msra.mxu1 %v43_v2  ;;  %3437 = vst [vmem:[#allocation9_spill] sm:$0xff] %v2412_v7  ;;  %284 = vmatprep.subr.mxu0 %v2412_v7  ;;  %v2418_v9 = vld [vmem:[#allocation3 + $0x1e0] sm:$0xff]  ;;  %v42_v10 = vld [vmem:[%s3338_s1 + $0x18] sm:$0xff]  ;;  %v2424_v11 = vld [vmem:[#allocation3 + $0x1c8] sm:$0xff]  ;;  %s2323_s27 = scalar_lea.vmem %s2018_s26, 16  ;;  %s2327_s28 = scalar_lea.vmem %s2018_s26, 32 }
  0x12   :  { %103 = vmatprep.subr.mxu1 %v40_v3  ;;  %285 = vmatpush1.msra.mxu0 %v2418_v9  ;;  %v41_v12 = vld [vmem:[%s3338_s1 + $0x10] sm:$0xff]  ;;  %v2430_v13 = vld [vmem:[#allocation3 + $0x1c0] sm:$0xff]  ;;  %v2433_v14 = vld [vmem:[#allocation3 + $0x1f8] sm:$0xff]  ;;  %p2324_p5 = scmp.ne.s32.totalorder %s2018_s26, %s2323_s27  ;;  %p2328_p6 = scmp.lt.s32.totalorder %s2018_s26, %s2018_s26 }
  0x13   :  { %104 = vmatpush1.msra.mxu1 %v39_v4  ;;  %3438 = vst [vmem:[#allocation10_spill] sm:$0xff] %v2433_v14  ;;  %286 = vmatprep.subr.mxu0 %v2424_v11  ;;  %v2436_v15 = vld [vmem:[#allocation3 + $0x1f0] sm:$0xff]  ;;  %v2438_v16 = vld [vmem:[#allocation3 + $0x1a8] sm:$0xff]  ;;  %v2441_v17 = vld [vmem:[#allocation3 + $0x1d8] sm:$0xff]  ;;  %p2329_p7 = scmp.lt.s32.totalorder %s2327_s28, %s2323_s27 }
  0x14   :  { %2026 = vmatmul.mubr.msk.f32.vlgmr.msra.gmra.mxu1 %vm69_vm0, %v38_v5  ;;  %172 = vmatprep.subr.mxu1 %v46_v6  ;;  %v2443_v18 = vld [vmem:[#allocation3 + $0x1a0] sm:$0xff]  ;;  %v2447_v19 = vld [vmem:[#allocation3 + $0x1d0] sm:$0xff]  ;;  %v2449_v20 = vld [vmem:[#allocation3 + $0x188] sm:$0xff] }
  0x15   :  { %173 = vmatpush1.msra.mxu1 %v45_v8  ;;  %208 = vmatprep.mubr.f32.mxu1 %v3344_v0  ;;  %v2453_v21 = vld [vmem:[#allocation3 + $0x1b8] sm:$0xff]  ;;  %v2455_v22 = vld [vmem:[#allocation3 + $0x180] sm:$0xff]  ;;  %v2459_v23 = vld [vmem:[#allocation3 + $0x1b0] sm:$0xff]  ;;  %p2330_p8 = por %p2329_p7, %p2328_p6 }
  0x16   :  { %174 = vmatprep.subr.mxu1 %v42_v10  ;;  %287 = vmatpush1.msra.mxu0 %v2430_v13  ;;  %v2461_v24 = vld [vmem:[#allocation3 + $0x168] sm:$0xff]  ;;  %v2465_v25 = vld [vmem:[#allocation3 + $0x198] sm:$0xff]  ;;  %v2467_v26 = vld [vmem:[#allocation3 + $0x160] sm:$0xff] }
  0x17   :  { %175 = vmatpush1.msra.mxu1 %v41_v12  ;;  %288 = vmatprep.subr.mxu0 %v2438_v16  ;;  %v2471_v27 = vld [vmem:[#allocation3 + $0x190] sm:$0xff]  ;;  %v2473_v28 = vld [vmem:[#allocation3 + $0x148] sm:$0xff]  ;;  %v2477_v29 = vld [vmem:[#allocation3 + $0x178] sm:$0xff]  ;;  %p2331_p9 = pnand %p2330_p8, %p2324_p5 }
  0x18   :  { %2027 = vmatmul.mubr.msk.f32.vlgmr.msra.gmra.mxu1 %vm69_vm0, %v38_v5  ;;  %355 = vmatprep.subr.mxu1 %v2433_v14  ;;  %v2479_v30 = vld [vmem:[#allocation3 + $0x140] sm:$0xff]  ;;  %v2483_v31 = vld [vmem:[#allocation3 + $0x170] sm:$0xff]  ;;  %v2485_v32 = vld [vmem:[#allocation3 + $0x128] sm:$0xff] }
  0x19   :  { %356 = vmatpush1.msra.mxu1 %v2436_v15  ;;  %289 = vmatpush1.msra.mxu0 %v2443_v18  ;;  %v2489_v33 = vld [vmem:[#allocation3 + $0x158] sm:$0xff]  ;;  %v2491_v34 = vld [vmem:[#allocation3 + $0x120] sm:$0xff]  ;;  %v2495_v35 = vld [vmem:[#allocation3 + $0x150] sm:$0xff] }
  0x1a   :  { %357 = vmatprep.subr.mxu1 %v2441_v17  ;;  %290 = vmatprep.subr.mxu0 %v2449_v20  ;;  %v2497_v36 = vld [vmem:[#allocation3 + $0x108] sm:$0xff]  ;;  %v2501_v37 = vld [vmem:[#allocation3 + $0x138] sm:$0xff]  ;;  %v2503_v38 = vld [vmem:[#allocation3 + $0x100] sm:$0xff] }
  0x1b   :  { %358 = vmatpush1.msra.mxu1 %v2447_v19  ;;  %291 = vmatpush1.msra.mxu0 %v2455_v22  ;;  %v2507_v39 = vld [vmem:[#allocation3 + $0x130] sm:$0xff]  ;;  %v2509_v40 = vld [vmem:[#allocation3 + $0xe8] sm:$0xff]  ;;  %v2513_v41 = vld [vmem:[#allocation3 + $0x118] sm:$0xff] }
  0x1c   :  { %359 = vmatprep.subr.mxu1 %v2453_v21  ;;  %292 = vmatprep.subr.mxu0 %v2461_v24  ;;  %v2515_v42 = vld [vmem:[#allocation3 + $0xe0] sm:$0xff]  ;;  %v2519_v43 = vld [vmem:[#allocation3 + $0x110] sm:$0xff]  ;;  %v2521_v44 = vld [vmem:[#allocation3 + $0xc8] sm:$0xff] }
  0x1d   :  { %360 = vmatpush1.msra.mxu1 %v2459_v23  ;;  %293 = vmatpush1.msra.mxu0 %v2467_v26  ;;  %v2525_v45 = vld [vmem:[#allocation3 + $0xf8] sm:$0xff]  ;;  %v2527_v46 = vld [vmem:[#allocation3 + $0xc0] sm:$0xff]  ;;  %v2531_v47 = vld [vmem:[#allocation3 + $0xf0] sm:$0xff] }
  0x1e   :  { %361 = vmatprep.subr.mxu1 %v2465_v25  ;;  %294 = vmatprep.subr.mxu0 %v2473_v28  ;;  %v2533_v48 = vld [vmem:[#allocation3 + $0xa8] sm:$0xff]  ;;  %v2537_v49 = vld [vmem:[#allocation3 + $0xd8] sm:$0xff]  ;;  %v2539_v50 = vld [vmem:[#allocation3 + $0xa0] sm:$0xff] }
  0x1f   :  { %362 = vmatpush1.msra.mxu1 %v2471_v27  ;;  %295 = vmatpush1.msra.mxu0 %v2479_v30  ;;  %v2543_v51 = vld [vmem:[#allocation3 + $0xd0] sm:$0xff]  ;;  %v2545_v52 = vld [vmem:[#allocation3 + $0x88] sm:$0xff]  ;;  %v2549_v53 = vld [vmem:[#allocation3 + $0xb8] sm:$0xff] }
  0x20   :  { %363 = vmatprep.subr.mxu1 %v2477_v29  ;;  %296 = vmatprep.subr.mxu0 %v2485_v32  ;;  %3439 = vst [vmem:[#allocation11_spill] sm:$0xff] %v2545_v52  ;;  %v2551_v54 = vld [vmem:[#allocation3 + $0x80] sm:$0xff]  ;;  %v2555_v55 = vld [vmem:[#allocation3 + $0xb0] sm:$0xff]  ;;  %v2557_v56 = vld [vmem:[#allocation3 + $0x68] sm:$0xff] }
  0x21   :  { %364 = vmatpush1.msra.mxu1 %v2483_v31  ;;  %297 = vmatpush1.msra.mxu0 %v2491_v34  ;;  %3440 = vst [vmem:[#allocation12_spill] sm:$0xff] %v2551_v54  ;;  %3441 = vst [vmem:[#allocation13_spill] sm:$0xff] %v2555_v55  ;;  %v2561_v57 = vld [vmem:[#allocation3 + $0x98] sm:$0xff]  ;;  %v2563_v58 = vld [vmem:[#allocation3 + $0x60] sm:$0xff] }
  0x22   :  { %365 = vmatprep.subr.mxu1 %v2489_v33  ;;  %298 = vmatprep.subr.mxu0 %v2497_v36  ;;  %3442 = vst [vmem:[#allocation14_spill] sm:$0xff] %v2557_v56  ;;  %3443 = vst [vmem:[#allocation15_spill] sm:$0xff] %v2561_v57  ;;  %v2567_v59 = vld [vmem:[#allocation3 + $0x90] sm:$0xff]  ;;  %v2569_v60 = vld [vmem:[#allocation3 + $0x48] sm:$0xff] }
  0x23   :  { %366 = vmatpush1.msra.mxu1 %v2495_v35  ;;  %299 = vmatpush1.msra.mxu0 %v2503_v38  ;;  %3444 = vst [vmem:[#allocation16_spill] sm:$0xff] %v2563_v58  ;;  %3445 = vst [vmem:[#allocation17_spill] sm:$0xff] %v2567_v59  ;;  %v2573_v61 = vld [vmem:[#allocation3 + $0x78] sm:$0xff]  ;;  %v2575_v62 = vld [vmem:[#allocation3 + $0x40] sm:$0xff] }
  0x24   :  { %367 = vmatprep.subr.mxu1 %v2501_v37  ;;  %300 = vmatprep.subr.mxu0 %v2509_v40  ;;  %3446 = vst [vmem:[#allocation18_spill] sm:$0xff] %v2569_v60  ;;  %3447 = vst [vmem:[#allocation19_spill] sm:$0xff] %v2573_v61  ;;  %v2579_v63 = vld [vmem:[#allocation3 + $0x70] sm:$0xff]  ;;  %v2581_v1 = vld [vmem:[#allocation3 + $0x28] sm:$0xff] }
  0x25   :  { %368 = vmatpush1.msra.mxu1 %v2507_v39  ;;  %301 = vmatpush1.msra.mxu0 %v2515_v42  ;;  %3448 = vst [vmem:[#allocation20_spill] sm:$0xff] %v2575_v62  ;;  %3449 = vst [vmem:[#allocation21_spill] sm:$0xff] %v2579_v63  ;;  %v2585_v2 = vld [vmem:[#allocation3 + $0x58] sm:$0xff]  ;;  %v2587_v3 = vld [vmem:[#allocation3 + $0x20] sm:$0xff] }
  0x26   :  { %369 = vmatprep.subr.mxu1 %v2513_v41  ;;  %302 = vmatprep.subr.mxu0 %v2521_v44  ;;  %3450 = vst [vmem:[#allocation22_spill] sm:$0xff] %v2581_v1  ;;  %3451 = vst [vmem:[#allocation23_spill] sm:$0xff] %v2585_v2  ;;  %v2591_v4 = vld [vmem:[#allocation3 + $0x50] sm:$0xff]  ;;  %v2593_v5 = vld [vmem:[#allocation3 + $0x8] sm:$0xff] }
  0x27   :  { %370 = vmatpush1.msra.mxu1 %v2519_v43  ;;  %303 = vmatpush1.msra.mxu0 %v2527_v46  ;;  %3452 = vst [vmem:[#allocation24_spill] sm:$0xff] %v2587_v3  ;;  %3453 = vst [vmem:[#allocation25_spill] sm:$0xff] %v2591_v4  ;;  %v2597_v6 = vld [vmem:[#allocation3 + $0x38] sm:$0xff]  ;;  %v2599_v8 = vld [vmem:[#allocation3] sm:$0xff] }
  0x28   :  { %371 = vmatprep.subr.mxu1 %v2525_v45  ;;  %304 = vmatprep.subr.mxu0 %v2533_v48  ;;  %3454 = vst [vmem:[#allocation26_spill] sm:$0xff] %v2593_v5  ;;  %3455 = vst [vmem:[#allocation27_spill] sm:$0xff] %v2597_v6  ;;  %v2603_v10 = vld [vmem:[#allocation3 + $0x30] sm:$0xff]  ;;  %v2607_v12 = vld [vmem:[#allocation3 + $0x18] sm:$0xff] }
  0x29   :  { %372 = vmatpush1.msra.mxu1 %v2531_v47  ;;  %305 = vmatpush1.msra.mxu0 %v2539_v50  ;;  %3456 = vst [vmem:[#allocation28_spill] sm:$0xff] %v2599_v8  ;;  %3457 = vst [vmem:[#allocation29_spill] sm:$0xff] %v2603_v10  ;;  %v2611_v0 = vld [vmem:[#allocation3 + $0x10] sm:$0xff] }
  0x2a   :  { %373 = vmatprep.subr.mxu1 %v2537_v49  ;;  %306 = vmatprep.subr.mxu0 %v2545_v52  ;;  %3458 = vst [vmem:[#allocation30_spill] sm:$0xff] %v2607_v12  ;;  %3459 = vst [vmem:[#allocation31_spill] sm:$0xff] %v2611_v0 }
  0x2b   :  { %374 = vmatpush1.msra.mxu1 %v2543_v51  ;;  %307 = vmatpush1.msra.mxu0 %v2551_v54 }
  0x2c   :  { %375 = vmatprep.subr.mxu1 %v2549_v53  ;;  %308 = vmatprep.subr.mxu0 %v2557_v56 }
  0x2d   :  { %376 = vmatpush1.msra.mxu1 %v2555_v55  ;;  %309 = vmatpush1.msra.mxu0 %v2563_v58 }
  0x2e   :  { %377 = vmatprep.subr.mxu1 %v2561_v57  ;;  %310 = vmatprep.subr.mxu0 %v2569_v60 }
  0x2f   :  { %378 = vmatpush1.msra.mxu1 %v2567_v59  ;;  %311 = vmatpush1.msra.mxu0 %v2575_v62 }
  0x30   :  { %379 = vmatprep.subr.mxu1 %v2573_v61  ;;  %312 = vmatprep.subr.mxu0 %v2581_v1  ;;  %v3460_v1 = vmov 0.0  }
  0x31   :  { %380 = vmatpush1.msra.mxu1 %v2579_v63  ;;  %313 = vmatpush1.msra.mxu0 %v2587_v3 }
  0x32   :  { %381 = vmatprep.subr.mxu1 %v2585_v2  ;;  %314 = vmatprep.subr.mxu0 %v2593_v5 }
  0x33   :  { %382 = vmatpush1.msra.mxu1 %v2591_v4  ;;  %315 = vmatpush1.msra.mxu0 %v2599_v8 }
  0x34   :  { %383 = vmatprep.subr.mxu1 %v2597_v6  ;;  %349 = vmatmul.mubr.f32.vlgmr.msra.gmra.mxu0 %v3460_v1 }
  0x35   :  { %384 = vmatpush1.msra.mxu1 %v2603_v10  ;;  %419 = vmatprep.mubr.f32.mxu1 %v3460_v1 }
  0x36   :  { %385 = vmatprep.subr.mxu1 %v2607_v12  ;;  %489 = vmatprep.subr.mxu0 %v2412_v7 }
  0x37   :  { %386 = vmatpush1.msra.mxu1 %v2611_v0  ;;  %490 = vmatpush1.msra.mxu0 %v2418_v9 }
  0x38   :  { %420 = vmatmul.mubr.f32.vlgmr.msra.gmra.mxu1 %v3460_v1  ;;  %560 = vmatprep.subr.mxu1 %v2433_v14 }
  0x39   :  { %561 = vmatpush1.msra.mxu1 %v2436_v15  ;;  %491 = vmatprep.subr.mxu0 %v2424_v11 }
  0x3a   :  { %562 = vmatprep.subr.mxu1 %v2441_v17  ;;  %492 = vmatpush1.msra.mxu0 %v2430_v13 }
  0x3b   :  { %563 = vmatpush1.msra.mxu1 %v2447_v19  ;;  %493 = vmatprep.subr.mxu0 %v2438_v16 }
  0x3c   :  { %564 = vmatprep.subr.mxu1 %v2453_v21  ;;  %494 = vmatpush1.msra.mxu0 %v2443_v18 }
  0x3d   :  { %565 = vmatpush1.msra.mxu1 %v2459_v23  ;;  %495 = vmatprep.subr.mxu0 %v2449_v20 }
  0x3e   :  { %566 = vmatprep.subr.mxu1 %v2465_v25  ;;  %496 = vmatpush1.msra.mxu0 %v2455_v22 }
  0x3f   :  { %567 = vmatpush1.msra.mxu1 %v2471_v27  ;;  %497 = vmatprep.subr.mxu0 %v2461_v24 }
  0x40   :  { %568 = vmatprep.subr.mxu1 %v2477_v29  ;;  %498 = vmatpush1.msra.mxu0 %v2467_v26 }
  0x41   :  { %569 = vmatpush1.msra.mxu1 %v2483_v31  ;;  %499 = vmatprep.subr.mxu0 %v2473_v28 }
  0x42   :  { %570 = vmatprep.subr.mxu1 %v2489_v33  ;;  %500 = vmatpush1.msra.mxu0 %v2479_v30 }
  0x43   :  { %571 = vmatpush1.msra.mxu1 %v2495_v35  ;;  %501 = vmatprep.subr.mxu0 %v2485_v32 }
  0x44   :  { %572 = vmatprep.subr.mxu1 %v2501_v37  ;;  %502 = vmatpush1.msra.mxu0 %v2491_v34 }
  0x45   :  { %573 = vmatpush1.msra.mxu1 %v2507_v39  ;;  %503 = vmatprep.subr.mxu0 %v2497_v36 }
  0x46   :  { %574 = vmatprep.subr.mxu1 %v2513_v41  ;;  %504 = vmatpush1.msra.mxu0 %v2503_v38 }
  0x47   :  { %575 = vmatpush1.msra.mxu1 %v2519_v43  ;;  %505 = vmatprep.subr.mxu0 %v2509_v40 }
  0x48   :  { %576 = vmatprep.subr.mxu1 %v2525_v45  ;;  %506 = vmatpush1.msra.mxu0 %v2515_v42 }
  0x49   :  { %577 = vmatpush1.msra.mxu1 %v2531_v47  ;;  %507 = vmatprep.subr.mxu0 %v2521_v44 }
  0x4a   :  { %578 = vmatprep.subr.mxu1 %v2537_v49  ;;  %508 = vmatpush1.msra.mxu0 %v2527_v46 }
  0x4b   :  { %579 = vmatpush1.msra.mxu1 %v2543_v51  ;;  %509 = vmatprep.subr.mxu0 %v2533_v48 }
  0x4c   :  { %580 = vmatprep.subr.mxu1 %v2549_v53  ;;  %510 = vmatpush1.msra.mxu0 %v2539_v50 }
  0x4d   :  { %581 = vmatpush1.msra.mxu1 %v2555_v55  ;;  %511 = vmatprep.subr.mxu0 %v2545_v52 }
  0x4e   :  { %582 = vmatprep.subr.mxu1 %v2561_v57  ;;  %512 = vmatpush1.msra.mxu0 %v2551_v54  ;;  %v3461_v57 = vld [vmem:[#allocation22_spill] sm:$0xff] }
  0x4f   :  { %583 = vmatpush1.msra.mxu1 %v2567_v59  ;;  %513 = vmatprep.subr.mxu0 %v2557_v56  ;;  %v2351_v56 = vmov 1966171168  }
  0x50   :  { %584 = vmatprep.subr.mxu1 %v2573_v61  ;;  %514 = vmatpush1.msra.mxu0 %v2563_v58  ;;  %v433_v59 = vunpack.c.l.s4 %v2351_v56 }
  0x51   :  { %585 = vmatpush1.msra.mxu1 %v2579_v63  ;;  %515 = vmatprep.subr.mxu0 %v2569_v60 }
  0x52   :  { %586 = vmatprep.subr.mxu1 %v2585_v2  ;;  %516 = vmatpush1.msra.mxu0 %v2575_v62 }
  0x53   :  { %587 = vmatpush1.msra.mxu1 %v2591_v4  ;;  %517 = vmatprep.subr.mxu0 %v3461_v57 }
  0x54   :  { %588 = vmatprep.subr.mxu1 %v2597_v6  ;;  %518 = vmatpush1.msra.mxu0 %v2587_v3  ;;  %v49_v6 = vlaneseq }
  0x55   :  { %589 = vmatpush1.msra.mxu1 %v2603_v10  ;;  %519 = vmatprep.subr.mxu0 %v2593_v5  ;;  %v47_v5 = vld [vmem:[%s3340_s3] sm:$0xf] }
  0x56   :  { %590 = vmatprep.subr.mxu1 %v2607_v12  ;;  %520 = vmatpush1.msra.mxu0 %v2599_v8  ;;  %v50_v3 = vshrl.u32 %v49_v6, 7 }
  0x57   :  { %553 = vmatprep.mubr.f32.mxu0 %v3460_v1  ;;  %591 = vmatpush1.msra.mxu1 %v2611_v0 }
  0x58   :  { %624 = vmatprep.mubr.f32.mxu1 %v3460_v1  ;;  %694 = vmatprep.subr.mxu0 %v2412_v7  ;;  %v51_v57 = vsub.s32 0, %v50_v3  ;;  %v55_v12 = vsub.s32 1, %v50_v3  ;;  %v59_v8 = vsub.s32 2, %v50_v3  ;;  %v63_v62 = vsub.s32 3, %v50_v3 }
  0x59   :  { %765 = vmatprep.subr.mxu1 %v2433_v14 }
  0x5a   :  { %v52_v10 = vrot.slane %v47_v5, %v51_v57  ;;  %v56_v4 = vrot.slane %v47_v5, %v55_v12  ;;  %v60_v60 = vrot.slane %v47_v5, %v59_v8  ;;  %v64_v63 = vrot.slane %v47_v5, %v63_v62 }
  0x5b   :  { %v434_v57 = vunpack.c.0.s8 %v433_v59 }
  0x5d   :  { %v2690_v55 = vsub.s32 %v434_v57, %v50_v3 }
  0xd4   :  { %v139_v2 = vpop.f32.mrf.mxu1 }
  0xd5   :  { %v140_v0 = vadd.f32 %v139_v2, %v52_v10 }
  0xd6   :  { %v141_v1 = vpop.f32.mrf.mxu1 }
  0xd7   :  { %215 = vst [vmem:[#allocation2] sm:$0xff] %v140_v0  ;;  %v142_v7 = vadd.f32 %v141_v1, %v56_v4 }
  0xd8   :  { %v210_v14 = vpop.f32.mrf.mxu1 }
  0xd9   :  { %216 = vst [vmem:[#allocation2 + $0x8] sm:$0xff] %v142_v7  ;;  %v211_v6 = vadd.f32 %v210_v14, %v60_v60 }
  0xda   :  { %v212_v58 = vpop.f32.mrf.mxu1 }
  0xdb   :  { %217 = vst [vmem:[#allocation2 + $0x10] sm:$0xff] %v211_v6  ;;  %v213_v61 = vadd.f32 %v212_v58, %v64_v63 }
  0xdd   :  { %218 = vst [vmem:[#allocation2 + $0x18] sm:$0xff] %v213_v61 }
  0xe4   :  { %v219_v58 = vld [vmem:[#allocation2] ss:$8 sm:$0xf] }
  0xf4   :  { %v350_v54 = vpop.f32.mrf.mxu0 }
  0xf6   :  { %v352_v12 = vpop.f32.mrf.mxu0 }
  0xf7   :  { %v430_v2 = vcombine.low %v350_v54, %v352_v12 }
  0xf8   :  { %v421_v52 = vpop.f32.mrf.mxu1 }
  0xf9   :  { %v438_v62 = vrot.slane %v430_v2, %v2690_v55 }
  0xfa   :  { %v423_v8 = vpop.f32.mrf.mxu1 }
  0xfb   :  { %v431_v0 = vcombine.low %v421_v52, %v423_v8 }
  0xfd   :  { %v445_v7 = vrot.slane %v431_v0, %v2690_v55 }
  0xff   :  { %v446_v14 = vcombine.low %v438_v62, %v445_v7 }
 0x101   :  { %v453_v60 = vrot.slane %v446_v14, %v2690_v55 }
 0x103   :  { %v455_v61 = vadd.f32 %v453_v60, %v219_v58 }
 0x105   :  { %v2028_v63 = vmul.f32 -1.442695, %v455_v61  ;;  %v463_v56 = vrot.slane %v455_v61, 1  ;;  %v474_v1 = vrot.slane %v455_v61, 3  ;;  %v471_v54 = vrot.slane %v455_v61, 2  ;;  %v3462_v61 = vld [vmem:[#allocation13_spill] sm:$0xff] }
 0x107   :  { %2111 = vpow2.f32 %v2028_v63  ;;  %v2029_v59 = vmul.f32 -1.442695, %v463_v56  ;;  %v2030_v3 = vmul.f32 -1.442695, %v474_v1  ;;  %v3463_v63 = vld [vmem:[#allocation11_spill] sm:$0xff]  ;;  %v3466_v1 = vld [vmem:[#allocation17_spill] sm:$0xff] }
 0x108   :  { %v3464_v56 = vld [vmem:[#allocation15_spill] sm:$0xff] }
 0x109   :  { %2113 = vpow2.f32 %v2029_v59  ;;  %v3465_v59 = vld [vmem:[#allocation12_spill] sm:$0xff] }
 0x10a   :  { %2115 = vpow2.f32 %v2030_v3  ;;  %v3467_v3 = vld [vmem:[#allocation14_spill] sm:$0xff] }
 0x114   :  { %v2112_v4 = vpop.eup %2111 }
 0x115   :  { %v459_v5 = vadd.f32 1.0, %v2112_v4  ;;  %v3468_v4 = vld [vmem:[#allocation19_spill] sm:$0xff] }
 0x116   :  { %v2114_v52 = vpop.eup %2113 }
 0x117   :  { %2117 = vrcp.f32 %v459_v5  ;;  %v468_v10 = vadd.f32 1.0, %v2114_v52  ;;  %v2116_v6 = vpop.eup %2115  ;;  %v3470_v5 = vld [vmem:[#allocation21_spill] sm:$0xff]  ;;  %v3471_v52 = vld [vmem:[#allocation18_spill] sm:$0xff] }
 0x118   :  { %2119 = vtanh.f32 %v471_v54  ;;  %v479_v8 = vadd.f32 1.0, %v2116_v6  ;;  %v3469_v54 = vld [vmem:[#allocation16_spill] sm:$0xff] }
 0x119   :  { %2121 = vrcp.f32 %v468_v10  ;;  %v3472_v10 = vld [vmem:[#allocation23_spill] sm:$0xff]  ;;  %v3473_v6 = vld [vmem:[#allocation20_spill] sm:$0xff] }
 0x11a   :  { %2123 = vrcp.f32 %v479_v8  ;;  %v3477_v8 = vld [vmem:[#allocation24_spill] sm:$0xff] }
 0x124   :  { %v2118_v57 = vpop.eup %2117 }
 0x125   :  { %v2120_v12 = vpop.eup %2119 }
 0x126   :  { %v2122_v2 = vpop.eup %2121  ;;  %v483_v62 = vmul.f32 %v2120_v12, %v2118_v57  ;;  %v3474_v57 = vld [vmem:[#allocation25_spill] sm:$0xff]  ;;  %v3475_v12 = vld [vmem:[#allocation22_spill] sm:$0xff] }
 0x127   :  { %v482_v0 = vmul.f32 0.0, %v2122_v2  ;;  %v2124_v14 = vpop.eup %2123  ;;  %v3476_v2 = vld [vmem:[#allocation27_spill] sm:$0xff] }
 0x129   :  { %v2695_v7 = vadd.f32 %v483_v62, %v482_v0  ;;  %v3478_v0 = vld [vmem:[#allocation29_spill] sm:$0xff]  ;;  %v3479_v62 = vld [vmem:[#allocation26_spill] sm:$0xff] }
 0x12b   :  { %2125 = vtanh.f32 %v2695_v7 }
 0x138   :  { %v2126_v60 = vpop.eup %2125 }
 0x139   :  { %v486_v58 = vmul.f32 %v2126_v60, %v2124_v14  ;;  %v3480_v14 = vld [vmem:[#allocation30_spill] sm:$0xff]  ;;  %v3481_v60 = vld [vmem:[#allocation28_spill] sm:$0xff] }
 0x13b   :  { %554 = vmatmul.mubr.f32.vlgmr.msra.gmra.mxu0 %v486_v58  ;;  %625 = vmatmul.mubr.f32.vlgmr.msra.gmra.mxu1 %v486_v58  ;;  %v3482_v58 = vmov 0.0  }
 0x13c   :  { %695 = vmatpush1.msra.mxu0 %v2418_v9  ;;  %766 = vmatpush1.msra.mxu1 %v2436_v15 }
 0x13d   :  { %696 = vmatprep.subr.mxu0 %v2424_v11  ;;  %767 = vmatprep.subr.mxu1 %v2441_v17 }
 0x13e   :  { %697 = vmatpush1.msra.mxu0 %v2430_v13  ;;  %768 = vmatpush1.msra.mxu1 %v2447_v19 }
 0x13f   :  { %698 = vmatprep.subr.mxu0 %v2438_v16  ;;  %769 = vmatprep.subr.mxu1 %v2453_v21 }
 0x140   :  { %699 = vmatpush1.msra.mxu0 %v2443_v18  ;;  %770 = vmatpush1.msra.mxu1 %v2459_v23 }
 0x141   :  { %700 = vmatprep.subr.mxu0 %v2449_v20  ;;  %771 = vmatprep.subr.mxu1 %v2465_v25 }
 0x142   :  { %701 = vmatpush1.msra.mxu0 %v2455_v22  ;;  %772 = vmatpush1.msra.mxu1 %v2471_v27 }
 0x143   :  { %702 = vmatprep.subr.mxu0 %v2461_v24  ;;  %773 = vmatprep.subr.mxu1 %v2477_v29 }
 0x144   :  { %703 = vmatpush1.msra.mxu0 %v2467_v26  ;;  %774 = vmatpush1.msra.mxu1 %v2483_v31 }
 0x145   :  { %704 = vmatprep.subr.mxu0 %v2473_v28  ;;  %775 = vmatprep.subr.mxu1 %v2489_v33 }
 0x146   :  { %705 = vmatpush1.msra.mxu0 %v2479_v30  ;;  %776 = vmatpush1.msra.mxu1 %v2495_v35 }
 0x147   :  { %706 = vmatprep.subr.mxu0 %v2485_v32  ;;  %777 = vmatprep.subr.mxu1 %v2501_v37 }
 0x148   :  { %707 = vmatpush1.msra.mxu0 %v2491_v34  ;;  %778 = vmatpush1.msra.mxu1 %v2507_v39 }
 0x149   :  { %708 = vmatprep.subr.mxu0 %v2497_v36  ;;  %779 = vmatprep.subr.mxu1 %v2513_v41 }
 0x14a   :  { %709 = vmatpush1.msra.mxu0 %v2503_v38  ;;  %780 = vmatpush1.msra.mxu1 %v2519_v43 }
 0x14b   :  { %710 = vmatprep.subr.mxu0 %v2509_v40  ;;  %781 = vmatprep.subr.mxu1 %v2525_v45 }
 0x14c   :  { %711 = vmatpush1.msra.mxu0 %v2515_v42  ;;  %782 = vmatpush1.msra.mxu1 %v2531_v47 }
 0x14d   :  { %712 = vmatprep.subr.mxu0 %v2521_v44  ;;  %783 = vmatprep.subr.mxu1 %v2537_v49 }
 0x14e   :  { %713 = vmatpush1.msra.mxu0 %v2527_v46  ;;  %784 = vmatpush1.msra.mxu1 %v2543_v51 }
 0x14f   :  { %714 = vmatprep.subr.mxu0 %v2533_v48  ;;  %785 = vmatprep.subr.mxu1 %v2549_v53 }
 0x150   :  { %715 = vmatpush1.msra.mxu0 %v2539_v50  ;;  %786 = vmatpush1.msra.mxu1 %v3462_v61 }
 0x151   :  { %716 = vmatprep.subr.mxu0 %v3463_v63  ;;  %787 = vmatprep.subr.mxu1 %v3464_v56 }
 0x152   :  { %717 = vmatpush1.msra.mxu0 %v3465_v59  ;;  %788 = vmatpush1.msra.mxu1 %v3466_v1 }
 0x153   :  { %718 = vmatprep.subr.mxu0 %v3467_v3  ;;  %789 = vmatprep.subr.mxu1 %v3468_v4 }
 0x154   :  { %719 = vmatpush1.msra.mxu0 %v3469_v54  ;;  %790 = vmatpush1.msra.mxu1 %v3470_v5 }
 0x155   :  { %720 = vmatprep.subr.mxu0 %v3471_v52  ;;  %791 = vmatprep.subr.mxu1 %v3472_v10  ;;  %v3483_v10 = vld [vmem:[#allocation31_spill] sm:$0xff] }
 0x156   :  { %721 = vmatpush1.msra.mxu0 %v3473_v6  ;;  %792 = vmatpush1.msra.mxu1 %v3474_v57  ;;  %v3484_v57 = vld [vmem:[#allocation9_spill] sm:$0xff] }
 0x157   :  { %722 = vmatprep.subr.mxu0 %v3475_v12  ;;  %793 = vmatprep.subr.mxu1 %v3476_v2  ;;  %v3485_v12 = vld [vmem:[#allocation10_spill] sm:$0xff] }
 0x158   :  { %723 = vmatpush1.msra.mxu0 %v3477_v8  ;;  %794 = vmatpush1.msra.mxu1 %v3478_v0 }
 0x159   :  { %724 = vmatprep.subr.mxu0 %v3479_v62  ;;  %795 = vmatprep.subr.mxu1 %v3480_v14 }
 0x15a   :  { %725 = vmatpush1.msra.mxu0 %v3481_v60  ;;  %758 = vmatprep.mubr.f32.mxu0 %v3482_v58 }
 0x15b   :  { %796 = vmatpush1.msra.mxu1 %v3483_v10  ;;  %829 = vmatprep.mubr.f32.mxu1 %v3482_v58  ;;  %v488_v10 = vld [vmem:[#allocation2 + $0x1] ss:$8 sm:$0xf] }
 0x15c   :  { %899 = vmatprep.subr.mxu0 %v3484_v57  ;;  %970 = vmatprep.subr.mxu1 %v3485_v12 }
 0x1fb   :  { %v555_v2 = vpop.f32.mrf.mxu0  ;;  %v626_v8 = vpop.f32.mrf.mxu1 }
 0x1fd   :  { %v557_v6 = vpop.f32.mrf.mxu0  ;;  %v628_v0 = vpop.f32.mrf.mxu1 }
 0x1fe   :  { %v635_v52 = vcombine.low %v555_v2, %v557_v6  ;;  %v636_v62 = vcombine.low %v626_v8, %v628_v0 }
 0x200   :  { %v643_v14 = vrot.slane %v635_v52, %v2690_v55  ;;  %v650_v60 = vrot.slane %v636_v62, %v2690_v55 }
 0x202   :  { %v651_v5 = vcombine.low %v643_v14, %v650_v60  ;;  %v3489_v14 = vld [vmem:[#allocation14_spill] sm:$0xff]  ;;  %v3490_v60 = vld [vmem:[#allocation19_spill] sm:$0xff] }
 0x204   :  { %v658_v54 = vrot.slane %v651_v5, %v2690_v55 }
 0x206   :  { %v660_v4 = vadd.f32 %v658_v54, %v488_v10 }
 0x208   :  { %v2031_v58 = vmul.f32 -1.442695, %v660_v4  ;;  %v668_v3 = vrot.slane %v660_v4, 1  ;;  %v679_v12 = vrot.slane %v660_v4, 3  ;;  %v676_v56 = vrot.slane %v660_v4, 2 }
 0x20a   :  { %2127 = vpow2.f32 %v2031_v58  ;;  %v2032_v57 = vmul.f32 -1.442695, %v668_v3  ;;  %v2033_v1 = vmul.f32 -1.442695, %v679_v12  ;;  %v3488_v12 = vld [vmem:[#allocation17_spill] sm:$0xff]  ;;  %v3491_v58 = vld [vmem:[#allocation16_spill] sm:$0xff] }
 0x20c   :  { %2129 = vpow2.f32 %v2032_v57 }
 0x20d   :  { %2131 = vpow2.f32 %v2033_v1 }
 0x217   :  { %v2128_v59 = vpop.eup %2127 }
 0x218   :  { %v664_v6 = vadd.f32 1.0, %v2128_v59 }
 0x219   :  { %v2130_v2 = vpop.eup %2129 }
 0x21a   :  { %2133 = vrcp.f32 %v664_v6  ;;  %v673_v52 = vadd.f32 1.0, %v2130_v2  ;;  %v2132_v8 = vpop.eup %2131  ;;  %v3492_v6 = vld [vmem:[#allocation21_spill] sm:$0xff]  ;;  %v3493_v2 = vld [vmem:[#allocation18_spill] sm:$0xff] }
 0x21b   :  { %2135 = vtanh.f32 %v676_v56  ;;  %v684_v10 = vadd.f32 1.0, %v2132_v8  ;;  %v3487_v56 = vld [vmem:[#allocation12_spill] sm:$0xff] }
 0x21c   :  { %2137 = vrcp.f32 %v673_v52  ;;  %v3494_v52 = vld [vmem:[#allocation23_spill] sm:$0xff]  ;;  %v3495_v8 = vld [vmem:[#allocation20_spill] sm:$0xff] }
 0x21d   :  { %2139 = vrcp.f32 %v684_v10  ;;  %v3499_v10 = vld [vmem:[#allocation24_spill] sm:$0xff] }
 0x227   :  { %v2134_v5 = vpop.eup %2133 }
 0x228   :  { %v2136_v0 = vpop.eup %2135 }
 0x229   :  { %v2138_v54 = vpop.eup %2137  ;;  %v688_v3 = vmul.f32 %v2136_v0, %v2134_v5  ;;  %v3496_v5 = vld [vmem:[#allocation25_spill] sm:$0xff]  ;;  %v3497_v0 = vld [vmem:[#allocation22_spill] sm:$0xff] }
 0x22a   :  { %v687_v62 = vmul.f32 %v2138_v54, %v2695_v7  ;;  %v2140_v59 = vpop.eup %2139  ;;  %v3486_v7 = vld [vmem:[#allocation15_spill] sm:$0xff] }
 0x22b   :  { %v3498_v54 = vld [vmem:[#allocation27_spill] sm:$0xff] }
 0x22c   :  { %v2768_v57 = vadd.f32 %v688_v3, %v687_v62  ;;  %v3500_v62 = vld [vmem:[#allocation29_spill] sm:$0xff]  ;;  %v3501_v3 = vld [vmem:[#allocation26_spill] sm:$0xff] }
 0x22e   :  { %2141 = vtanh.f32 %v2768_v57 }
 0x23b   :  { %v2142_v4 = vpop.eup %2141 }
 0x23c   :  { %v691_v1 = vmul.f32 %v2142_v4, %v2140_v59  ;;  %v3502_v59 = vld [vmem:[#allocation30_spill] sm:$0xff]  ;;  %v3503_v4 = vld [vmem:[#allocation28_spill] sm:$0xff] }
 0x23e   :  { %759 = vmatmul.mubr.f32.vlgmr.msra.gmra.mxu0 %v691_v1  ;;  %830 = vmatmul.mubr.f32.vlgmr.msra.gmra.mxu1 %v691_v1  ;;  %v3504_v1 = vmov 0.0  }
 0x23f   :  { %900 = vmatpush1.msra.mxu0 %v2418_v9  ;;  %971 = vmatpush1.msra.mxu1 %v2436_v15 }
 0x240   :  { %901 = vmatprep.subr.mxu0 %v2424_v11  ;;  %972 = vmatprep.subr.mxu1 %v2441_v17 }
 0x241   :  { %902 = vmatpush1.msra.mxu0 %v2430_v13  ;;  %973 = vmatpush1.msra.mxu1 %v2447_v19 }
 0x242   :  { %903 = vmatprep.subr.mxu0 %v2438_v16  ;;  %974 = vmatprep.subr.mxu1 %v2453_v21 }
 0x243   :  { %904 = vmatpush1.msra.mxu0 %v2443_v18  ;;  %975 = vmatpush1.msra.mxu1 %v2459_v23 }
 0x244   :  { %905 = vmatprep.subr.mxu0 %v2449_v20  ;;  %976 = vmatprep.subr.mxu1 %v2465_v25 }
 0x245   :  { %906 = vmatpush1.msra.mxu0 %v2455_v22  ;;  %977 = vmatpush1.msra.mxu1 %v2471_v27 }
 0x246   :  { %907 = vmatprep.subr.mxu0 %v2461_v24  ;;  %978 = vmatprep.subr.mxu1 %v2477_v29 }
 0x247   :  { %908 = vmatpush1.msra.mxu0 %v2467_v26  ;;  %979 = vmatpush1.msra.mxu1 %v2483_v31 }
 0x248   :  { %909 = vmatprep.subr.mxu0 %v2473_v28  ;;  %980 = vmatprep.subr.mxu1 %v2489_v33 }
 0x249   :  { %910 = vmatpush1.msra.mxu0 %v2479_v30  ;;  %981 = vmatpush1.msra.mxu1 %v2495_v35 }
 0x24a   :  { %911 = vmatprep.subr.mxu0 %v2485_v32  ;;  %982 = vmatprep.subr.mxu1 %v2501_v37 }
 0x24b   :  { %912 = vmatpush1.msra.mxu0 %v2491_v34  ;;  %983 = vmatpush1.msra.mxu1 %v2507_v39 }
 0x24c   :  { %913 = vmatprep.subr.mxu0 %v2497_v36  ;;  %984 = vmatprep.subr.mxu1 %v2513_v41 }
 0x24d   :  { %914 = vmatpush1.msra.mxu0 %v2503_v38  ;;  %985 = vmatpush1.msra.mxu1 %v2519_v43 }
 0x24e   :  { %915 = vmatprep.subr.mxu0 %v2509_v40  ;;  %986 = vmatprep.subr.mxu1 %v2525_v45 }
 0x24f   :  { %916 = vmatpush1.msra.mxu0 %v2515_v42  ;;  %987 = vmatpush1.msra.mxu1 %v2531_v47 }
 0x250   :  { %917 = vmatprep.subr.mxu0 %v2521_v44  ;;  %988 = vmatprep.subr.mxu1 %v2537_v49 }
 0x251   :  { %918 = vmatpush1.msra.mxu0 %v2527_v46  ;;  %989 = vmatpush1.msra.mxu1 %v2543_v51 }
 0x252   :  { %919 = vmatprep.subr.mxu0 %v2533_v48  ;;  %990 = vmatprep.subr.mxu1 %v2549_v53 }
 0x253   :  { %920 = vmatpush1.msra.mxu0 %v2539_v50  ;;  %991 = vmatpush1.msra.mxu1 %v3462_v61 }
 0x254   :  { %921 = vmatprep.subr.mxu0 %v3463_v63  ;;  %992 = vmatprep.subr.mxu1 %v3486_v7 }
 0x255   :  { %922 = vmatpush1.msra.mxu0 %v3487_v56  ;;  %993 = vmatpush1.msra.mxu1 %v3488_v12 }
 0x256   :  { %923 = vmatprep.subr.mxu0 %v3489_v14  ;;  %994 = vmatprep.subr.mxu1 %v3490_v60 }
 0x257   :  { %924 = vmatpush1.msra.mxu0 %v3491_v58  ;;  %995 = vmatpush1.msra.mxu1 %v3492_v6 }
 0x258   :  { %925 = vmatprep.subr.mxu0 %v3493_v2  ;;  %996 = vmatprep.subr.mxu1 %v3494_v52  ;;  %v3505_v52 = vld [vmem:[#allocation31_spill] sm:$0xff] }
 0x259   :  { %926 = vmatpush1.msra.mxu0 %v3495_v8  ;;  %997 = vmatpush1.msra.mxu1 %v3496_v5  ;;  %v3506_v5 = vld [vmem:[#allocation9_spill] sm:$0xff] }
 0x25a   :  { %927 = vmatprep.subr.mxu0 %v3497_v0  ;;  %998 = vmatprep.subr.mxu1 %v3498_v54  ;;  %v3507_v0 = vld [vmem:[#allocation10_spill] sm:$0xff] }
 0x25b   :  { %928 = vmatpush1.msra.mxu0 %v3499_v10  ;;  %999 = vmatpush1.msra.mxu1 %v3500_v62 }
 0x25c   :  { %929 = vmatprep.subr.mxu0 %v3501_v3  ;;  %1000 = vmatprep.subr.mxu1 %v3502_v59 }
 0x25d   :  { %930 = vmatpush1.msra.mxu0 %v3503_v4  ;;  %963 = vmatprep.mubr.f32.mxu0 %v3504_v1 }
 0x25e   :  { %1001 = vmatpush1.msra.mxu1 %v3505_v52  ;;  %1034 = vmatprep.mubr.f32.mxu1 %v3504_v1  ;;  %v693_v52 = vld [vmem:[#allocation2 + $0x2] ss:$8 sm:$0xf] }
 0x25f   :  { %1104 = vmatprep.subr.mxu0 %v3506_v5  ;;  %1175 = vmatprep.subr.mxu1 %v3507_v0 }
 0x2fe   :  { %v760_v54 = vpop.f32.mrf.mxu0  ;;  %v831_v10 = vpop.f32.mrf.mxu1 }
 0x300   :  { %v762_v8 = vpop.f32.mrf.mxu0  ;;  %v833_v62 = vpop.f32.mrf.mxu1 }
 0x301   :  { %v840_v2 = vcombine.low %v760_v54, %v762_v8  ;;  %v841_v3 = vcombine.low %v831_v10, %v833_v62 }
 0x303   :  { %v848_v59 = vrot.slane %v840_v2, %v2690_v55  ;;  %v855_v4 = vrot.slane %v841_v3, %v2690_v55 }
 0x305   :  { %v856_v6 = vcombine.low %v848_v59, %v855_v4 }
 0x307   :  { %v863_v58 = vrot.slane %v856_v6, %v2690_v55 }
 0x309   :  { %v865_v60 = vadd.f32 %v863_v58, %v693_v52 }
 0x30b   :  { %v2034_v1 = vmul.f32 -1.442695, %v865_v60  ;;  %v873_v14 = vrot.slane %v865_v60, 1  ;;  %v884_v0 = vrot.slane %v865_v60, 3  ;;  %v881_v7 = vrot.slane %v865_v60, 2 }
 0x30d   :  { %2143 = vpow2.f32 %v2034_v1  ;;  %v2035_v5 = vmul.f32 -1.442695, %v873_v14  ;;  %v2036_v12 = vmul.f32 -1.442695, %v884_v0 }
 0x30f   :  { %2145 = vpow2.f32 %v2035_v5 }
 0x310   :  { %2147 = vpow2.f32 %v2036_v12 }
 0x31a   :  { %v2144_v56 = vpop.eup %2143 }
 0x31b   :  { %v869_v8 = vadd.f32 1.0, %v2144_v56 }
 0x31c   :  { %v2146_v54 = vpop.eup %2145 }
 0x31d   :  { %2149 = vrcp.f32 %v869_v8  ;;  %v878_v2 = vadd.f32 1.0, %v2146_v54  ;;  %v2148_v10 = vpop.eup %2147 }
 0x31e   :  { %2151 = vtanh.f32 %v881_v7  ;;  %v889_v52 = vadd.f32 1.0, %v2148_v10 }
 0x31f   :  { %2153 = vrcp.f32 %v878_v2 }
 0x320   :  { %2155 = vrcp.f32 %v889_v52  ;;  %v2924_v52 = vld [vmem:[#allocation3 + $0x1f0] sm:$0xff] }
 0x32a   :  { %v2150_v6 = vpop.eup %2149 }
 0x32b   :  { %v2152_v62 = vpop.eup %2151 }
 0x32c   :  { %v2154_v58 = vpop.eup %2153  ;;  %v893_v14 = vmul.f32 %v2152_v62, %v2150_v6 }
 0x32d   :  { %v892_v3 = vmul.f32 %v2154_v58, %v2768_v57  ;;  %v2156_v56 = vpop.eup %2155  ;;  %v2921_v58 = vld [vmem:[#allocation3 + $0x1e0] sm:$0xff] }
 0x32f   :  { %v2841_v59 = vadd.f32 %v893_v14, %v892_v3  ;;  %v2927_v3 = vld [vmem:[#allocation3 + $0x1c8] sm:$0xff]  ;;  %v2930_v14 = vld [vmem:[#allocation3 + $0x1d8] sm:$0xff] }
 0x331   :  { %2157 = vtanh.f32 %v2841_v59 }
 0x33e   :  { %v2158_v60 = vpop.eup %2157 }
 0x33f   :  { %v896_v12 = vmul.f32 %v2158_v60, %v2156_v56  ;;  %v2936_v56 = vld [vmem:[#allocation3 + $0x1d0] sm:$0xff]  ;;  %v2939_v60 = vld [vmem:[#allocation3 + $0x1a8] sm:$0xff] }
 0x341   :  { %964 = vmatmul.mubr.f32.vlgmr.msra.gmra.mxu0 %v896_v12  ;;  %1035 = vmatmul.mubr.f32.vlgmr.msra.gmra.mxu1 %v896_v12  ;;  %v2942_v12 = vld [vmem:[#allocation3 + $0x1b8] sm:$0xff] }
 0x342   :  { %1105 = vmatpush1.msra.mxu0 %v2418_v9  ;;  %1176 = vmatpush1.msra.mxu1 %v2436_v15  ;;  %v3508_v9 = vld [vmem:[#allocation15_spill] sm:$0xff]  ;;  %v3511_v15 = vld [vmem:[#allocation14_spill] sm:$0xff] }
 0x343   :  { %1106 = vmatprep.subr.mxu0 %v2424_v11  ;;  %1177 = vmatprep.subr.mxu1 %v2441_v17  ;;  %v3509_v11 = vld [vmem:[#allocation12_spill] sm:$0xff] }
 0x344   :  { %1107 = vmatpush1.msra.mxu0 %v2430_v13  ;;  %1178 = vmatpush1.msra.mxu1 %v2447_v19  ;;  %v3510_v13 = vld [vmem:[#allocation17_spill] sm:$0xff]  ;;  %v3513_v17 = vld [vmem:[#allocation16_spill] sm:$0xff]  ;;  %v3515_v19 = vld [vmem:[#allocation18_spill] sm:$0xff] }
 0x345   :  { %1108 = vmatprep.subr.mxu0 %v2438_v16  ;;  %1179 = vmatprep.subr.mxu1 %v2453_v21  ;;  %v3512_v16 = vld [vmem:[#allocation19_spill] sm:$0xff]  ;;  %v3517_v21 = vld [vmem:[#allocation20_spill] sm:$0xff] }
 0x346   :  { %1109 = vmatpush1.msra.mxu0 %v2443_v18  ;;  %1180 = vmatpush1.msra.mxu1 %v2459_v23  ;;  %v3514_v18 = vld [vmem:[#allocation21_spill] sm:$0xff]  ;;  %v3519_v23 = vld [vmem:[#allocation22_spill] sm:$0xff] }
 0x347   :  { %1110 = vmatprep.subr.mxu0 %v2449_v20  ;;  %1181 = vmatprep.subr.mxu1 %v2465_v25  ;;  %v3516_v20 = vld [vmem:[#allocation23_spill] sm:$0xff]  ;;  %v3521_v25 = vld [vmem:[#allocation24_spill] sm:$0xff] }
 0x348   :  { %1111 = vmatpush1.msra.mxu0 %v2455_v22  ;;  %1182 = vmatpush1.msra.mxu1 %v2471_v27  ;;  %v3518_v22 = vld [vmem:[#allocation25_spill] sm:$0xff]  ;;  %v3523_v27 = vld [vmem:[#allocation26_spill] sm:$0xff] }
 0x349   :  { %1112 = vmatprep.subr.mxu0 %v2461_v24  ;;  %1183 = vmatprep.subr.mxu1 %v2477_v29  ;;  %v3520_v24 = vld [vmem:[#allocation27_spill] sm:$0xff]  ;;  %v3525_v29 = vld [vmem:[#allocation28_spill] sm:$0xff] }
 0x34a   :  { %1113 = vmatpush1.msra.mxu0 %v2467_v26  ;;  %1184 = vmatpush1.msra.mxu1 %v2483_v31  ;;  %v3522_v26 = vld [vmem:[#allocation29_spill] sm:$0xff]  ;;  %v3527_v31 = vld [vmem:[#allocation31_spill] sm:$0xff] }
 0x34b   :  { %1114 = vmatprep.subr.mxu0 %v2473_v28  ;;  %1185 = vmatprep.subr.mxu1 %v2489_v33  ;;  %v3524_v28 = vld [vmem:[#allocation30_spill] sm:$0xff]  ;;  %v2911_v33 = vld [vmem:[#allocation3 + $0x1f8] sm:$0xff] }
 0x34c   :  { %1115 = vmatpush1.msra.mxu0 %v2479_v30  ;;  %1186 = vmatpush1.msra.mxu1 %v2495_v35  ;;  %v3526_v30 = vmov 0.0   ;;  %3529 = vst [vmem:[#allocation11_spill] sm:$0xff] %v2911_v33 }
 0x34d   :  { %1116 = vmatprep.subr.mxu0 %v2485_v32  ;;  %1187 = vmatprep.subr.mxu1 %v2501_v37  ;;  %v2908_v32 = vld [vmem:[#allocation3 + $0x1e8] sm:$0xff] }
 0x34e   :  { %1117 = vmatpush1.msra.mxu0 %v2491_v34  ;;  %1188 = vmatpush1.msra.mxu1 %v2507_v39  ;;  %3528 = vst [vmem:[#allocation13_spill] sm:$0xff] %v2908_v32 }
 0x34f   :  { %1118 = vmatprep.subr.mxu0 %v2497_v36  ;;  %1189 = vmatprep.subr.mxu1 %v2513_v41 }
 0x350   :  { %1119 = vmatpush1.msra.mxu0 %v2503_v38  ;;  %1190 = vmatpush1.msra.mxu1 %v2519_v43 }
 0x351   :  { %1120 = vmatprep.subr.mxu0 %v2509_v40  ;;  %1191 = vmatprep.subr.mxu1 %v2525_v45 }
 0x352   :  { %1121 = vmatpush1.msra.mxu0 %v2515_v42  ;;  %1192 = vmatpush1.msra.mxu1 %v2531_v47 }
 0x353   :  { %1122 = vmatprep.subr.mxu0 %v2521_v44  ;;  %1193 = vmatprep.subr.mxu1 %v2537_v49  ;;  %v898_v44 = vld [vmem:[#allocation2 + $0x3] ss:$8 sm:$0xf] }
 0x354   :  { %1123 = vmatpush1.msra.mxu0 %v2527_v46  ;;  %1194 = vmatpush1.msra.mxu1 %v2543_v51 }
 0x355   :  { %1124 = vmatprep.subr.mxu0 %v2533_v48  ;;  %1195 = vmatprep.subr.mxu1 %v2549_v53 }
 0x356   :  { %1125 = vmatpush1.msra.mxu0 %v2539_v50  ;;  %1196 = vmatpush1.msra.mxu1 %v3462_v61 }
 0x357   :  { %1126 = vmatprep.subr.mxu0 %v3463_v63  ;;  %1197 = vmatprep.subr.mxu1 %v3508_v9  ;;  %v2945_v9 = vld [vmem:[#allocation3 + $0x1a0] sm:$0xff] }
 0x358   :  { %1127 = vmatpush1.msra.mxu0 %v3509_v11  ;;  %1198 = vmatpush1.msra.mxu1 %v3510_v13  ;;  %v2948_v11 = vld [vmem:[#allocation3 + $0x1b0] sm:$0xff]  ;;  %v2951_v13 = vld [vmem:[#allocation3 + $0x188] sm:$0xff] }
 0x359   :  { %1128 = vmatprep.subr.mxu0 %v3511_v15  ;;  %1199 = vmatprep.subr.mxu1 %v3512_v16  ;;  %v2954_v15 = vld [vmem:[#allocation3 + $0x198] sm:$0xff]  ;;  %v2957_v16 = vld [vmem:[#allocation3 + $0x180] sm:$0xff] }
 0x35a   :  { %1129 = vmatpush1.msra.mxu0 %v3513_v17  ;;  %1200 = vmatpush1.msra.mxu1 %v3514_v18  ;;  %v2960_v17 = vld [vmem:[#allocation3 + $0x190] sm:$0xff]  ;;  %v2963_v18 = vld [vmem:[#allocation3 + $0x168] sm:$0xff] }
 0x35b   :  { %1130 = vmatprep.subr.mxu0 %v3515_v19  ;;  %1201 = vmatprep.subr.mxu1 %v3516_v20  ;;  %v2966_v19 = vld [vmem:[#allocation3 + $0x178] sm:$0xff]  ;;  %v2969_v20 = vld [vmem:[#allocation3 + $0x160] sm:$0xff] }
 0x35c   :  { %1131 = vmatpush1.msra.mxu0 %v3517_v21  ;;  %1202 = vmatpush1.msra.mxu1 %v3518_v22  ;;  %v2972_v21 = vld [vmem:[#allocation3 + $0x170] sm:$0xff]  ;;  %v2975_v22 = vld [vmem:[#allocation3 + $0x148] sm:$0xff] }
 0x35d   :  { %1132 = vmatprep.subr.mxu0 %v3519_v23  ;;  %1203 = vmatprep.subr.mxu1 %v3520_v24  ;;  %v2978_v23 = vld [vmem:[#allocation3 + $0x158] sm:$0xff]  ;;  %v2981_v24 = vld [vmem:[#allocation3 + $0x140] sm:$0xff] }
 0x35e   :  { %1133 = vmatpush1.msra.mxu0 %v3521_v25  ;;  %1204 = vmatpush1.msra.mxu1 %v3522_v26  ;;  %v2984_v25 = vld [vmem:[#allocation3 + $0x150] sm:$0xff]  ;;  %v2987_v26 = vld [vmem:[#allocation3 + $0x128] sm:$0xff] }
 0x35f   :  { %1134 = vmatprep.subr.mxu0 %v3523_v27  ;;  %1205 = vmatprep.subr.mxu1 %v3524_v28  ;;  %v2990_v27 = vld [vmem:[#allocation3 + $0x138] sm:$0xff]  ;;  %v2993_v28 = vld [vmem:[#allocation3 + $0x120] sm:$0xff] }
 0x360   :  { %1135 = vmatpush1.msra.mxu0 %v3525_v29  ;;  %1168 = vmatprep.mubr.f32.mxu0 %v3526_v30  ;;  %v2996_v29 = vld [vmem:[#allocation3 + $0x130] sm:$0xff] }
 0x361   :  { %1206 = vmatpush1.msra.mxu1 %v3527_v31  ;;  %1239 = vmatprep.mubr.f32.mxu1 %v3526_v30  ;;  %v2999_v31 = vld [vmem:[#allocation3 + $0x108] sm:$0xff] }
 0x362   :  { %1309 = vmatprep.subr.mxu0 %v2908_v32  ;;  %1380 = vmatprep.subr.mxu1 %v2911_v33 }
 0x401   :  { %v965_v34 = vpop.f32.mrf.mxu0  ;;  %v1036_v35 = vpop.f32.mrf.mxu1 }
 0x403   :  { %v967_v36 = vpop.f32.mrf.mxu0  ;;  %v1038_v37 = vpop.f32.mrf.mxu1 }
 0x404   :  { %v1045_v38 = vcombine.low %v965_v34, %v967_v36  ;;  %v1046_v39 = vcombine.low %v1036_v35, %v1038_v37  ;;  %v3002_v34 = vld [vmem:[#allocation3 + $0x118] sm:$0xff]  ;;  %v3005_v35 = vld [vmem:[#allocation3 + $0x100] sm:$0xff]  ;;  %v3008_v36 = vld [vmem:[#allocation3 + $0x110] sm:$0xff] }
 0x405   :  { %v3011_v37 = vld [vmem:[#allocation3 + $0xe8] sm:$0xff] }
 0x406   :  { %v1053_v40 = vrot.slane %v1045_v38, %v2690_v55  ;;  %v1060_v41 = vrot.slane %v1046_v39, %v2690_v55  ;;  %v3014_v38 = vld [vmem:[#allocation3 + $0xf8] sm:$0xff]  ;;  %v3017_v39 = vld [vmem:[#allocation3 + $0xe0] sm:$0xff] }
 0x408   :  { %v1061_v42 = vcombine.low %v1053_v40, %v1060_v41  ;;  %v3020_v40 = vld [vmem:[#allocation3 + $0xf0] sm:$0xff]  ;;  %v3023_v41 = vld [vmem:[#allocation3 + $0xc8] sm:$0xff] }
 0x40a   :  { %v1068_v43 = vrot.slane %v1061_v42, %v2690_v55  ;;  %v3026_v42 = vld [vmem:[#allocation3 + $0xd8] sm:$0xff] }
 0x40c   :  { %v1070_v45 = vadd.f32 %v1068_v43, %v898_v44  ;;  %v3029_v43 = vld [vmem:[#allocation3 + $0xc0] sm:$0xff]  ;;  %v3032_v44 = vld [vmem:[#allocation3 + $0xd0] sm:$0xff] }
 0x40e   :  { %v2037_v46 = vmul.f32 -1.442695, %v1070_v45  ;;  %v1078_v47 = vrot.slane %v1070_v45, 1  ;;  %v1089_v49 = vrot.slane %v1070_v45, 3  ;;  %v1086_v53 = vrot.slane %v1070_v45, 2  ;;  %v3035_v45 = vld [vmem:[#allocation3 + $0xa8] sm:$0xff] }
 0x410   :  { %2159 = vpow2.f32 %v2037_v46  ;;  %v2038_v48 = vmul.f32 -1.442695, %v1078_v47  ;;  %v2039_v50 = vmul.f32 -1.442695, %v1089_v49  ;;  %v3038_v46 = vld [vmem:[#allocation3 + $0xb8] sm:$0xff]  ;;  %v3041_v47 = vld [vmem:[#allocation3 + $0xa0] sm:$0xff] }
 0x411   :  { %v3047_v49 = vld [vmem:[#allocation3 + $0x88] sm:$0xff] }
 0x412   :  { %2161 = vpow2.f32 %v2038_v48  ;;  %v3044_v48 = vld [vmem:[#allocation3 + $0xb0] sm:$0xff] }
 0x413   :  { %2163 = vpow2.f32 %v2039_v50  ;;  %v3050_v50 = vld [vmem:[#allocation3 + $0x98] sm:$0xff] }
 0x414   :  { %3530 = vst [vmem:[#allocation9_spill] sm:$0xff] %v3050_v50 }
 0x41d   :  { %v2160_v51 = vpop.eup %2159 }
 0x41e   :  { %v1074_v61 = vadd.f32 1.0, %v2160_v51  ;;  %v3053_v51 = vld [vmem:[#allocation3 + $0x80] sm:$0xff] }
 0x41f   :  { %v2162_v63 = vpop.eup %2161  ;;  %3531 = vst [vmem:[#allocation10_spill] sm:$0xff] %v3053_v51 }
 0x420   :  { %2165 = vrcp.f32 %v1074_v61  ;;  %v1083_v57 = vadd.f32 1.0, %v2162_v63  ;;  %v2164_v7 = vpop.eup %2163  ;;  %v3059_v61 = vld [vmem:[#allocation3 + $0x68] sm:$0xff]  ;;  %v3062_v63 = vld [vmem:[#allocation3 + $0x78] sm:$0xff] }
 0x421   :  { %2167 = vtanh.f32 %v1086_v53  ;;  %v1094_v0 = vadd.f32 1.0, %v2164_v7  ;;  %v3056_v53 = vld [vmem:[#allocation3 + $0x90] sm:$0xff]  ;;  %3533 = vst [vmem:[#allocation12_spill] sm:$0xff] %v3059_v61  ;;  %3534 = vst [vmem:[#allocation17_spill] sm:$0xff] %v3062_v63 }
 0x422   :  { %2169 = vrcp.f32 %v1083_v57  ;;  %3532 = vst [vmem:[#allocation15_spill] sm:$0xff] %v3056_v53  ;;  %v3065_v57 = vld [vmem:[#allocation3 + $0x60] sm:$0xff]  ;;  %v3068_v7 = vld [vmem:[#allocation3 + $0x70] sm:$0xff] }
 0x423   :  { %2171 = vrcp.f32 %v1094_v0  ;;  %3535 = vst [vmem:[#allocation14_spill] sm:$0xff] %v3065_v57  ;;  %3536 = vst [vmem:[#allocation19_spill] sm:$0xff] %v3068_v7  ;;  %v3080_v0 = vld [vmem:[#allocation3 + $0x50] sm:$0xff] }
 0x424   :  { %3540 = vst [vmem:[#allocation23_spill] sm:$0xff] %v3080_v0 }
 0x42d   :  { %v2166_v4 = vpop.eup %2165 }
 0x42e   :  { %v2168_v1 = vpop.eup %2167 }
 0x42f   :  { %v2170_v5 = vpop.eup %2169  ;;  %v1098_v54 = vmul.f32 %v2168_v1, %v2166_v4  ;;  %v3071_v4 = vld [vmem:[#allocation3 + $0x48] sm:$0xff]  ;;  %v3074_v1 = vld [vmem:[#allocation3 + $0x58] sm:$0xff] }
 0x430   :  { %v1097_v8 = vmul.f32 %v2170_v5, %v2841_v59  ;;  %v2172_v10 = vpop.eup %2171  ;;  %v2933_v59 = vld [vmem:[#allocation3 + $0x1c0] sm:$0xff]  ;;  %3537 = vst [vmem:[#allocation16_spill] sm:$0xff] %v3071_v4  ;;  %3538 = vst [vmem:[#allocation21_spill] sm:$0xff] %v3074_v1 }
 0x431   :  { %v3077_v5 = vld [vmem:[#allocation3 + $0x40] sm:$0xff] }
 0x432   :  { %v2918_v2 = vadd.f32 %v1098_v54, %v1097_v8  ;;  %3539 = vst [vmem:[#allocation18_spill] sm:$0xff] %v3077_v5  ;;  %v3083_v8 = vld [vmem:[#allocation3 + $0x28] sm:$0xff]  ;;  %v3086_v54 = vld [vmem:[#allocation3 + $0x38] sm:$0xff] }
 0x433   :  { %3541 = vst [vmem:[#allocation20_spill] sm:$0xff] %v3083_v8  ;;  %3542 = vst [vmem:[#allocation25_spill] sm:$0xff] %v3086_v54 }
 0x434   :  { %2173 = vtanh.f32 %v2918_v2 }
 0x441   :  { %v2174_v6 = vpop.eup %2173 }
 0x442   :  { %v1101_v62 = vmul.f32 %v2174_v6, %v2172_v10  ;;  %v3089_v10 = vld [vmem:[#allocation3 + $0x20] sm:$0xff]  ;;  %v3092_v6 = vld [vmem:[#allocation3 + $0x30] sm:$0xff] }
 0x443   :  { %3543 = vst [vmem:[#allocation22_spill] sm:$0xff] %v3089_v10  ;;  %3544 = vst [vmem:[#allocation27_spill] sm:$0xff] %v3092_v6 }
 0x444   :  { %1169 = vmatmul.mubr.f32.vlgmr.msra.gmra.mxu0 %v1101_v62  ;;  %1240 = vmatmul.mubr.f32.vlgmr.msra.gmra.mxu1 %v1101_v62  ;;  %v3095_v62 = vld [vmem:[#allocation3 + $0x8] sm:$0xff] }
 0x445   :  { %1310 = vmatpush1.msra.mxu0 %v2921_v58  ;;  %1381 = vmatpush1.msra.mxu1 %v2924_v52  ;;  %3545 = vst [vmem:[#allocation24_spill] sm:$0xff] %v3095_v62 }
 0x446   :  { %1311 = vmatprep.subr.mxu0 %v2927_v3  ;;  %1382 = vmatprep.subr.mxu1 %v2930_v14 }
 0x447   :  { %1312 = vmatpush1.msra.mxu0 %v2933_v59  ;;  %1383 = vmatpush1.msra.mxu1 %v2936_v56 }
 0x448   :  { %1313 = vmatprep.subr.mxu0 %v2939_v60  ;;  %1384 = vmatprep.subr.mxu1 %v2942_v12 }
 0x449   :  { %1314 = vmatpush1.msra.mxu0 %v2945_v9  ;;  %1385 = vmatpush1.msra.mxu1 %v2948_v11 }
 0x44a   :  { %1315 = vmatprep.subr.mxu0 %v2951_v13  ;;  %1386 = vmatprep.subr.mxu1 %v2954_v15 }
 0x44b   :  { %1316 = vmatpush1.msra.mxu0 %v2957_v16  ;;  %1387 = vmatpush1.msra.mxu1 %v2960_v17 }
 0x44c   :  { %1317 = vmatprep.subr.mxu0 %v2963_v18  ;;  %1388 = vmatprep.subr.mxu1 %v2966_v19 }
 0x44d   :  { %1318 = vmatpush1.msra.mxu0 %v2969_v20  ;;  %1389 = vmatpush1.msra.mxu1 %v2972_v21 }
 0x44e   :  { %1319 = vmatprep.subr.mxu0 %v2975_v22  ;;  %1390 = vmatprep.subr.mxu1 %v2978_v23 }
 0x44f   :  { %1320 = vmatpush1.msra.mxu0 %v2981_v24  ;;  %1391 = vmatpush1.msra.mxu1 %v2984_v25 }
 0x450   :  { %1321 = vmatprep.subr.mxu0 %v2987_v26  ;;  %1392 = vmatprep.subr.mxu1 %v2990_v27 }
 0x451   :  { %1322 = vmatpush1.msra.mxu0 %v2993_v28  ;;  %1393 = vmatpush1.msra.mxu1 %v2996_v29 }
 0x452   :  { %1323 = vmatprep.subr.mxu0 %v2999_v31  ;;  %1394 = vmatprep.subr.mxu1 %v3002_v34 }
 0x453   :  { %1324 = vmatpush1.msra.mxu0 %v3005_v35  ;;  %1395 = vmatpush1.msra.mxu1 %v3008_v36 }
 0x454   :  { %1325 = vmatprep.subr.mxu0 %v3011_v37  ;;  %1396 = vmatprep.subr.mxu1 %v3014_v38 }
 0x455   :  { %1326 = vmatpush1.msra.mxu0 %v3017_v39  ;;  %1397 = vmatpush1.msra.mxu1 %v3020_v40 }
 0x456   :  { %1327 = vmatprep.subr.mxu0 %v3023_v41  ;;  %1398 = vmatprep.subr.mxu1 %v3026_v42 }
 0x457   :  { %1328 = vmatpush1.msra.mxu0 %v3029_v43  ;;  %1399 = vmatpush1.msra.mxu1 %v3032_v44 }
 0x458   :  { %1329 = vmatprep.subr.mxu0 %v3035_v45  ;;  %1400 = vmatprep.subr.mxu1 %v3038_v46 }
 0x459   :  { %1330 = vmatpush1.msra.mxu0 %v3041_v47  ;;  %1401 = vmatpush1.msra.mxu1 %v3044_v48 }
 0x45a   :  { %1331 = vmatprep.subr.mxu0 %v3047_v49  ;;  %1402 = vmatprep.subr.mxu1 %v3050_v50 }
 0x45b   :  { %1332 = vmatpush1.msra.mxu0 %v3053_v51  ;;  %1403 = vmatpush1.msra.mxu1 %v3056_v53 }
 0x45c   :  { %1333 = vmatprep.subr.mxu0 %v3059_v61  ;;  %1404 = vmatprep.subr.mxu1 %v3062_v63 }
 0x45d   :  { %1334 = vmatpush1.msra.mxu0 %v3065_v57  ;;  %1405 = vmatpush1.msra.mxu1 %v3068_v7 }
 0x45e   :  { %1335 = vmatprep.subr.mxu0 %v3071_v4  ;;  %1406 = vmatprep.subr.mxu1 %v3074_v1 }
 0x45f   :  { %1336 = vmatpush1.msra.mxu0 %v3077_v5  ;;  %1407 = vmatpush1.msra.mxu1 %v3080_v0  ;;  %v3098_v0 = vld [vmem:[#allocation3 + $0x18] sm:$0xff] }
 0x460   :  { %1337 = vmatprep.subr.mxu0 %v3083_v8  ;;  %1408 = vmatprep.subr.mxu1 %v3086_v54  ;;  %3546 = vst [vmem:[#allocation29_spill] sm:$0xff] %v3098_v0  ;;  %v3101_v8 = vld [vmem:[#allocation3] sm:$0xff]  ;;  %v3105_v54 = vld [vmem:[#allocation3 + $0x10] sm:$0xff] }
 0x461   :  { %1338 = vmatpush1.msra.mxu0 %v3089_v10  ;;  %1409 = vmatpush1.msra.mxu1 %v3092_v6  ;;  %3547 = vst [vmem:[#allocation26_spill] sm:$0xff] %v3101_v8  ;;  %3548 = vst [vmem:[#allocation30_spill] sm:$0xff] %v3105_v54 }
 0x462   :  { %1339 = vmatprep.subr.mxu0 %v3095_v62  ;;  %1410 = vmatprep.subr.mxu1 %v3098_v0 }
 0x463   :  { %1340 = vmatpush1.msra.mxu0 %v3101_v8  ;;  %1373 = vmatprep.mubr.f32.mxu0 %v3526_v30 }
 0x464   :  { %1411 = vmatpush1.msra.mxu1 %v3105_v54  ;;  %1444 = vmatprep.mubr.f32.mxu1 %v3526_v30  ;;  %v1103_v54 = vld [vmem:[#allocation2 + $0x4] ss:$8 sm:$0xf] }
 0x465   :  { %1514 = vmatprep.subr.mxu0 %v2908_v32  ;;  %1585 = vmatprep.subr.mxu1 %v2911_v33 }
 0x504   :  { %v1170_v62 = vpop.f32.mrf.mxu0  ;;  %v1241_v6 = vpop.f32.mrf.mxu1 }
 0x506   :  { %v1172_v10 = vpop.f32.mrf.mxu0  ;;  %v1243_v0 = vpop.f32.mrf.mxu1 }
 0x507   :  { %v1250_v5 = vcombine.low %v1170_v62, %v1172_v10  ;;  %v1251_v1 = vcombine.low %v1241_v6, %v1243_v0  ;;  %v3553_v6 = vld [vmem:[#allocation17_spill] sm:$0xff]  ;;  %v3554_v62 = vld [vmem:[#allocation14_spill] sm:$0xff] }
 0x509   :  { %v1258_v8 = vrot.slane %v1250_v5, %v2690_v55  ;;  %v1265_v4 = vrot.slane %v1251_v1, %v2690_v55 }
 0x50b   :  { %v1266_v7 = vcombine.low %v1258_v8, %v1265_v4 }
 0x50d   :  { %v1273_v57 = vrot.slane %v1266_v7, %v2690_v55 }
 0x50f   :  { %v1275_v63 = vadd.f32 %v1273_v57, %v1103_v54  ;;  %v3552_v54 = vld [vmem:[#allocation12_spill] sm:$0xff] }
 0x511   :  { %v2040_v30 = vmul.f32 -1.442695, %v1275_v63  ;;  %v1283_v61 = vrot.slane %v1275_v63, 1  ;;  %v1294_v33 = vrot.slane %v1275_v63, 3  ;;  %v1291_v50 = vrot.slane %v1275_v63, 2  ;;  %v3551_v63 = vld [vmem:[#allocation15_spill] sm:$0xff] }
 0x513   :  { %2175 = vpow2.f32 %v2040_v30  ;;  %v2041_v32 = vmul.f32 -1.442695, %v1283_v61  ;;  %v2042_v53 = vmul.f32 -1.442695, %v1294_v33 }
 0x515   :  { %2177 = vpow2.f32 %v2041_v32 }
 0x516   :  { %2179 = vpow2.f32 %v2042_v53 }
 0x520   :  { %v2176_v51 = vpop.eup %2175 }
 0x521   :  { %v1279_v10 = vadd.f32 1.0, %v2176_v51 }
 0x522   :  { %v2178_v0 = vpop.eup %2177 }
 0x523   :  { %2181 = vrcp.f32 %v1279_v10  ;;  %v1288_v5 = vadd.f32 1.0, %v2178_v0  ;;  %v2180_v4 = vpop.eup %2179  ;;  %v3555_v10 = vld [vmem:[#allocation19_spill] sm:$0xff]  ;;  %v3556_v0 = vld [vmem:[#allocation16_spill] sm:$0xff] }
 0x524   :  { %2183 = vtanh.f32 %v1291_v50  ;;  %v1299_v8 = vadd.f32 1.0, %v2180_v4  ;;  %v3550_v50 = vld [vmem:[#allocation10_spill] sm:$0xff] }
 0x525   :  { %2185 = vrcp.f32 %v1288_v5  ;;  %v3557_v5 = vld [vmem:[#allocation21_spill] sm:$0xff]  ;;  %v3558_v4 = vld [vmem:[#allocation18_spill] sm:$0xff] }
 0x526   :  { %2187 = vrcp.f32 %v1299_v8  ;;  %v3562_v8 = vld [vmem:[#allocation22_spill] sm:$0xff] }
 0x530   :  { %v2182_v7 = vpop.eup %2181 }
 0x531   :  { %v2184_v1 = vpop.eup %2183 }
 0x532   :  { %v2186_v57 = vpop.eup %2185  ;;  %v1303_v61 = vmul.f32 %v2184_v1, %v2182_v7  ;;  %v3559_v7 = vld [vmem:[#allocation23_spill] sm:$0xff]  ;;  %v3560_v1 = vld [vmem:[#allocation20_spill] sm:$0xff] }
 0x533   :  { %v1302_v30 = vmul.f32 %v2186_v57, %v2918_v2  ;;  %v2188_v33 = vpop.eup %2187  ;;  %v3549_v2 = vld [vmem:[#allocation9_spill] sm:$0xff] }
 0x534   :  { %v3561_v57 = vld [vmem:[#allocation25_spill] sm:$0xff] }
 0x535   :  { %v3115_v32 = vadd.f32 %v1303_v61, %v1302_v30  ;;  %v3563_v30 = vld [vmem:[#allocation27_spill] sm:$0xff]  ;;  %v3564_v61 = vld [vmem:[#allocation24_spill] sm:$0xff] }
 0x537   :  { %2189 = vtanh.f32 %v3115_v32 }
 0x544   :  { %v2190_v51 = vpop.eup %2189 }
 0x545   :  { %v1306_v53 = vmul.f32 %v2190_v51, %v2188_v33  ;;  %v3565_v33 = vld [vmem:[#allocation29_spill] sm:$0xff]  ;;  %v3566_v51 = vld [vmem:[#allocation26_spill] sm:$0xff] }
 0x547   :  { %1374 = vmatmul.mubr.f32.vlgmr.msra.gmra.mxu0 %v1306_v53  ;;  %1445 = vmatmul.mubr.f32.vlgmr.msra.gmra.mxu1 %v1306_v53  ;;  %v3567_v53 = vmov 0.0  }
 0x548   :  { %1515 = vmatpush1.msra.mxu0 %v2921_v58  ;;  %1586 = vmatpush1.msra.mxu1 %v2924_v52 }
 0x549   :  { %1516 = vmatprep.subr.mxu0 %v2927_v3  ;;  %1587 = vmatprep.subr.mxu1 %v2930_v14 }
 0x54a   :  { %1517 = vmatpush1.msra.mxu0 %v2933_v59  ;;  %1588 = vmatpush1.msra.mxu1 %v2936_v56 }
 0x54b   :  { %1518 = vmatprep.subr.mxu0 %v2939_v60  ;;  %1589 = vmatprep.subr.mxu1 %v2942_v12 }
 0x54c   :  { %1519 = vmatpush1.msra.mxu0 %v2945_v9  ;;  %1590 = vmatpush1.msra.mxu1 %v2948_v11 }
 0x54d   :  { %1520 = vmatprep.subr.mxu0 %v2951_v13  ;;  %1591 = vmatprep.subr.mxu1 %v2954_v15 }
 0x54e   :  { %1521 = vmatpush1.msra.mxu0 %v2957_v16  ;;  %1592 = vmatpush1.msra.mxu1 %v2960_v17 }
 0x54f   :  { %1522 = vmatprep.subr.mxu0 %v2963_v18  ;;  %1593 = vmatprep.subr.mxu1 %v2966_v19 }
 0x550   :  { %1523 = vmatpush1.msra.mxu0 %v2969_v20  ;;  %1594 = vmatpush1.msra.mxu1 %v2972_v21 }
 0x551   :  { %1524 = vmatprep.subr.mxu0 %v2975_v22  ;;  %1595 = vmatprep.subr.mxu1 %v2978_v23 }
 0x552   :  { %1525 = vmatpush1.msra.mxu0 %v2981_v24  ;;  %1596 = vmatpush1.msra.mxu1 %v2984_v25 }
 0x553   :  { %1526 = vmatprep.subr.mxu0 %v2987_v26  ;;  %1597 = vmatprep.subr.mxu1 %v2990_v27 }
 0x554   :  { %1527 = vmatpush1.msra.mxu0 %v2993_v28  ;;  %1598 = vmatpush1.msra.mxu1 %v2996_v29 }
 0x555   :  { %1528 = vmatprep.subr.mxu0 %v2999_v31  ;;  %1599 = vmatprep.subr.mxu1 %v3002_v34 }
 0x556   :  { %1529 = vmatpush1.msra.mxu0 %v3005_v35  ;;  %1600 = vmatpush1.msra.mxu1 %v3008_v36 }
 0x557   :  { %1530 = vmatprep.subr.mxu0 %v3011_v37  ;;  %1601 = vmatprep.subr.mxu1 %v3014_v38 }
 0x558   :  { %1531 = vmatpush1.msra.mxu0 %v3017_v39  ;;  %1602 = vmatpush1.msra.mxu1 %v3020_v40 }
 0x559   :  { %1532 = vmatprep.subr.mxu0 %v3023_v41  ;;  %1603 = vmatprep.subr.mxu1 %v3026_v42 }
 0x55a   :  { %1533 = vmatpush1.msra.mxu0 %v3029_v43  ;;  %1604 = vmatpush1.msra.mxu1 %v3032_v44 }
 0x55b   :  { %1534 = vmatprep.subr.mxu0 %v3035_v45  ;;  %1605 = vmatprep.subr.mxu1 %v3038_v46 }
 0x55c   :  { %1535 = vmatpush1.msra.mxu0 %v3041_v47  ;;  %1606 = vmatpush1.msra.mxu1 %v3044_v48 }
 0x55d   :  { %1536 = vmatprep.subr.mxu0 %v3047_v49  ;;  %1607 = vmatprep.subr.mxu1 %v3549_v2 }
 0x55e   :  { %1537 = vmatpush1.msra.mxu0 %v3550_v50  ;;  %1608 = vmatpush1.msra.mxu1 %v3551_v63 }
 0x55f   :  { %1538 = vmatprep.subr.mxu0 %v3552_v54  ;;  %1609 = vmatprep.subr.mxu1 %v3553_v6 }
 0x560   :  { %1539 = vmatpush1.msra.mxu0 %v3554_v62  ;;  %1610 = vmatpush1.msra.mxu1 %v3555_v10 }
 0x561   :  { %1540 = vmatprep.subr.mxu0 %v3556_v0  ;;  %1611 = vmatprep.subr.mxu1 %v3557_v5  ;;  %v3568_v5 = vld [vmem:[#allocation30_spill] sm:$0xff] }
 0x562   :  { %1541 = vmatpush1.msra.mxu0 %v3558_v4  ;;  %1612 = vmatpush1.msra.mxu1 %v3559_v7  ;;  %v3569_v7 = vld [vmem:[#allocation13_spill] sm:$0xff] }
 0x563   :  { %1542 = vmatprep.subr.mxu0 %v3560_v1  ;;  %1613 = vmatprep.subr.mxu1 %v3561_v57  ;;  %v3570_v1 = vld [vmem:[#allocation11_spill] sm:$0xff] }
 0x564   :  { %1543 = vmatpush1.msra.mxu0 %v3562_v8  ;;  %1614 = vmatpush1.msra.mxu1 %v3563_v30 }
 0x565   :  { %1544 = vmatprep.subr.mxu0 %v3564_v61  ;;  %1615 = vmatprep.subr.mxu1 %v3565_v33 }
 0x566   :  { %1545 = vmatpush1.msra.mxu0 %v3566_v51  ;;  %1578 = vmatprep.mubr.f32.mxu0 %v3567_v53 }
 0x567   :  { %1616 = vmatpush1.msra.mxu1 %v3568_v5  ;;  %1649 = vmatprep.mubr.f32.mxu1 %v3567_v53  ;;  %v1308_v5 = vld [vmem:[#allocation2 + $0x5] ss:$8 sm:$0xf] }
 0x568   :  { %1719 = vmatprep.subr.mxu0 %v3569_v7  ;;  %1790 = vmatprep.subr.mxu1 %v3570_v1 }
 0x607   :  { %v1375_v57 = vpop.f32.mrf.mxu0  ;;  %v1446_v8 = vpop.f32.mrf.mxu1 }
 0x609   :  { %v1377_v4 = vpop.f32.mrf.mxu0  ;;  %v1448_v30 = vpop.f32.mrf.mxu1 }
 0x60a   :  { %v1455_v0 = vcombine.low %v1375_v57, %v1377_v4  ;;  %v1456_v61 = vcombine.low %v1446_v8, %v1448_v30 }
 0x60c   :  { %v1463_v33 = vrot.slane %v1455_v0, %v2690_v55  ;;  %v1470_v51 = vrot.slane %v1456_v61, %v2690_v55 }
 0x60e   :  { %v1471_v10 = vcombine.low %v1463_v33, %v1470_v51 }
 0x610   :  { %v1478_v62 = vrot.slane %v1471_v10, %v2690_v55 }
 0x612   :  { %v1480_v6 = vadd.f32 %v1478_v62, %v1308_v5 }
 0x614   :  { %v2043_v53 = vmul.f32 -1.442695, %v1480_v6  ;;  %v1488_v54 = vrot.slane %v1480_v6, 1  ;;  %v1499_v1 = vrot.slane %v1480_v6, 3  ;;  %v1496_v2 = vrot.slane %v1480_v6, 2 }
 0x616   :  { %2191 = vpow2.f32 %v2043_v53  ;;  %v2044_v7 = vmul.f32 -1.442695, %v1488_v54  ;;  %v2045_v63 = vmul.f32 -1.442695, %v1499_v1 }
 0x618   :  { %2193 = vpow2.f32 %v2044_v7 }
 0x619   :  { %2195 = vpow2.f32 %v2045_v63 }
 0x623   :  { %v2192_v50 = vpop.eup %2191 }
 0x624   :  { %v1484_v4 = vadd.f32 1.0, %v2192_v50 }
 0x625   :  { %v2194_v57 = vpop.eup %2193 }
 0x626   :  { %2197 = vrcp.f32 %v1484_v4  ;;  %v1493_v0 = vadd.f32 1.0, %v2194_v57  ;;  %v2196_v8 = vpop.eup %2195 }
 0x627   :  { %2199 = vtanh.f32 %v1496_v2  ;;  %v1504_v5 = vadd.f32 1.0, %v2196_v8 }
 0x628   :  { %2201 = vrcp.f32 %v1493_v0 }
 0x629   :  { %2203 = vrcp.f32 %v1504_v5  ;;  %v1934_v5 = vld [vmem:[%s3341_s4 + $0x60] sm:$0xff] }
 0x633   :  { %v2198_v10 = vpop.eup %2197 }
 0x634   :  { %v2200_v30 = vpop.eup %2199 }
 0x635   :  { %v2202_v62 = vpop.eup %2201  ;;  %v1508_v54 = vmul.f32 %v2200_v30, %v2198_v10  ;;  %v1937_v10 = vld [vmem:[%s3341_s4 + $0x78] sm:$0xff]  ;;  %v1936_v30 = vld [vmem:[%s3341_s4 + $0x70] sm:$0xff] }
 0x636   :  { %v1507_v61 = vmul.f32 %v2202_v62, %v3115_v32  ;;  %v2204_v50 = vpop.eup %2203  ;;  %v1935_v62 = vld [vmem:[%s3341_s4 + $0x68] sm:$0xff] }
 0x638   :  { %v3188_v33 = vadd.f32 %v1508_v54, %v1507_v61  ;;  %v1933_v61 = vld [vmem:[%s3341_s4 + $0x58] sm:$0xff]  ;;  %v1932_v54 = vld [vmem:[%s3341_s4 + $0x50] sm:$0xff] }
 0x63a   :  { %2205 = vtanh.f32 %v3188_v33 }
 0x647   :  { %v2206_v6 = vpop.eup %2205 }
 0x648   :  { %v1511_v63 = vmul.f32 %v2206_v6, %v2204_v50  ;;  %v1930_v50 = vld [vmem:[%s3341_s4 + $0x40] sm:$0xff]  ;;  %v1929_v6 = vld [vmem:[%s3341_s4 + $0x38] sm:$0xff] }
 0x64a   :  { %1579 = vmatmul.mubr.f32.vlgmr.msra.gmra.mxu0 %v1511_v63  ;;  %1650 = vmatmul.mubr.f32.vlgmr.msra.gmra.mxu1 %v1511_v63  ;;  %v1928_v63 = vld [vmem:[%s3341_s4 + $0x30] sm:$0xff] }
 0x64b   :  { %1720 = vmatpush1.msra.mxu0 %v2921_v58  ;;  %1791 = vmatpush1.msra.mxu1 %v2924_v52  ;;  %v3571_v58 = vld [vmem:[#allocation9_spill] sm:$0xff]  ;;  %v3572_v52 = vld [vmem:[#allocation10_spill] sm:$0xff] }
 0x64c   :  { %1721 = vmatprep.subr.mxu0 %v2927_v3  ;;  %1792 = vmatprep.subr.mxu1 %v2930_v14  ;;  %v3573_v3 = vld [vmem:[#allocation15_spill] sm:$0xff]  ;;  %v3574_v14 = vld [vmem:[#allocation12_spill] sm:$0xff] }
 0x64d   :  { %1722 = vmatpush1.msra.mxu0 %v2933_v59  ;;  %1793 = vmatpush1.msra.mxu1 %v2936_v56  ;;  %v3575_v59 = vld [vmem:[#allocation17_spill] sm:$0xff]  ;;  %v3576_v56 = vld [vmem:[#allocation14_spill] sm:$0xff] }
 0x64e   :  { %1723 = vmatprep.subr.mxu0 %v2939_v60  ;;  %1794 = vmatprep.subr.mxu1 %v2942_v12  ;;  %v3577_v60 = vld [vmem:[#allocation19_spill] sm:$0xff]  ;;  %v3578_v12 = vld [vmem:[#allocation16_spill] sm:$0xff] }
 0x64f   :  { %1724 = vmatpush1.msra.mxu0 %v2945_v9  ;;  %1795 = vmatpush1.msra.mxu1 %v2948_v11  ;;  %v3579_v9 = vld [vmem:[#allocation21_spill] sm:$0xff]  ;;  %v3580_v11 = vld [vmem:[#allocation18_spill] sm:$0xff] }
 0x650   :  { %1725 = vmatprep.subr.mxu0 %v2951_v13  ;;  %1796 = vmatprep.subr.mxu1 %v2954_v15  ;;  %v3581_v13 = vld [vmem:[#allocation23_spill] sm:$0xff]  ;;  %v3582_v15 = vld [vmem:[#allocation20_spill] sm:$0xff] }
 0x651   :  { %1726 = vmatpush1.msra.mxu0 %v2957_v16  ;;  %1797 = vmatpush1.msra.mxu1 %v2960_v17  ;;  %v3583_v16 = vld [vmem:[#allocation25_spill] sm:$0xff]  ;;  %v3584_v17 = vld [vmem:[#allocation22_spill] sm:$0xff] }
 0x652   :  { %1727 = vmatprep.subr.mxu0 %v2963_v18  ;;  %1798 = vmatprep.subr.mxu1 %v2966_v19  ;;  %v3585_v18 = vld [vmem:[#allocation27_spill] sm:$0xff]  ;;  %v3586_v19 = vld [vmem:[#allocation24_spill] sm:$0xff] }
 0x653   :  { %1728 = vmatpush1.msra.mxu0 %v2969_v20  ;;  %1799 = vmatpush1.msra.mxu1 %v2972_v21  ;;  %v3587_v20 = vld [vmem:[#allocation29_spill] sm:$0xff]  ;;  %v3588_v21 = vld [vmem:[#allocation26_spill] sm:$0xff] }
 0x654   :  { %1729 = vmatprep.subr.mxu0 %v2975_v22  ;;  %1800 = vmatprep.subr.mxu1 %v2978_v23  ;;  %v3589_v22 = vmov 0.0   ;;  %v3590_v23 = vld [vmem:[#allocation30_spill] sm:$0xff] }
 0x655   :  { %1730 = vmatpush1.msra.mxu0 %v2981_v24  ;;  %1801 = vmatpush1.msra.mxu1 %v2984_v25 }
 0x656   :  { %1731 = vmatprep.subr.mxu0 %v2987_v26  ;;  %1802 = vmatprep.subr.mxu1 %v2990_v27 }
 0x657   :  { %1732 = vmatpush1.msra.mxu0 %v2993_v28  ;;  %1803 = vmatpush1.msra.mxu1 %v2996_v29 }
 0x658   :  { %1733 = vmatprep.subr.mxu0 %v2999_v31  ;;  %1804 = vmatprep.subr.mxu1 %v3002_v34 }
 0x659   :  { %1734 = vmatpush1.msra.mxu0 %v3005_v35  ;;  %1805 = vmatpush1.msra.mxu1 %v3008_v36 }
 0x65a   :  { %1735 = vmatprep.subr.mxu0 %v3011_v37  ;;  %1806 = vmatprep.subr.mxu1 %v3014_v38  ;;  %v1513_v37 = vld [vmem:[#allocation2 + $0x6] ss:$8 sm:$0xf] }
 0x65b   :  { %1736 = vmatpush1.msra.mxu0 %v3017_v39  ;;  %1807 = vmatpush1.msra.mxu1 %v3020_v40 }
 0x65c   :  { %1737 = vmatprep.subr.mxu0 %v3023_v41  ;;  %1808 = vmatprep.subr.mxu1 %v3026_v42 }
 0x65d   :  { %1738 = vmatpush1.msra.mxu0 %v3029_v43  ;;  %1809 = vmatpush1.msra.mxu1 %v3032_v44 }
 0x65e   :  { %1739 = vmatprep.subr.mxu0 %v3035_v45  ;;  %1810 = vmatprep.subr.mxu1 %v3038_v46 }
 0x65f   :  { %1740 = vmatpush1.msra.mxu0 %v3041_v47  ;;  %1811 = vmatpush1.msra.mxu1 %v3044_v48 }
 0x660   :  { %1741 = vmatprep.subr.mxu0 %v3047_v49  ;;  %1812 = vmatprep.subr.mxu1 %v3571_v58  ;;  %v1927_v58 = vld [vmem:[%s3341_s4 + $0x28] sm:$0xff] }
 0x661   :  { %1742 = vmatpush1.msra.mxu0 %v3572_v52  ;;  %1813 = vmatpush1.msra.mxu1 %v3573_v3  ;;  %v1926_v52 = vld [vmem:[%s3341_s4 + $0x20] sm:$0xff]  ;;  %v1925_v3 = vld [vmem:[%s3341_s4 + $0x18] sm:$0xff] }
 0x662   :  { %1743 = vmatprep.subr.mxu0 %v3574_v14  ;;  %1814 = vmatprep.subr.mxu1 %v3575_v59  ;;  %v1924_v14 = vld [vmem:[%s3341_s4 + $0x10] sm:$0xff]  ;;  %v1923_v59 = vld [vmem:[%s3341_s4 + $0x8] sm:$0xff] }
 0x663   :  { %1744 = vmatpush1.msra.mxu0 %v3576_v56  ;;  %1815 = vmatpush1.msra.mxu1 %v3577_v60  ;;  %v1922_v56 = vld [vmem:[%s3341_s4] sm:$0xff] }
 0x664   :  { %1745 = vmatprep.subr.mxu0 %v3578_v12  ;;  %1816 = vmatprep.subr.mxu1 %v3579_v9 }
 0x665   :  { %1746 = vmatpush1.msra.mxu0 %v3580_v11  ;;  %1817 = vmatpush1.msra.mxu1 %v3581_v13 }
 0x666   :  { %1747 = vmatprep.subr.mxu0 %v3582_v15  ;;  %1818 = vmatprep.subr.mxu1 %v3583_v16 }
 0x667   :  { %1748 = vmatpush1.msra.mxu0 %v3584_v17  ;;  %1819 = vmatpush1.msra.mxu1 %v3585_v18 }
 0x668   :  { %1749 = vmatprep.subr.mxu0 %v3586_v19  ;;  %1820 = vmatprep.subr.mxu1 %v3587_v20  ;;  %v1718_v20 = vld [vmem:[#allocation2 + $0x7] ss:$8 sm:$0xf] }
 0x669   :  { %1750 = vmatpush1.msra.mxu0 %v3588_v21  ;;  %1783 = vmatprep.mubr.f32.mxu0 %v3589_v22 }
 0x66a   :  { %1821 = vmatpush1.msra.mxu1 %v3590_v23  ;;  %1854 = vmatprep.mubr.f32.mxu1 %v3589_v22 }
 0x66b   :  { %2069 = vmatprep.subr.mxu0 %v3589_v22 }
 0x70a   :  { %v1580_v24 = vpop.f32.mrf.mxu0  ;;  %v1651_v25 = vpop.f32.mrf.mxu1 }
 0x70c   :  { %v1582_v26 = vpop.f32.mrf.mxu0  ;;  %v1653_v27 = vpop.f32.mrf.mxu1 }
 0x70d   :  { %v1660_v28 = vcombine.low %v1580_v24, %v1582_v26  ;;  %v1661_v29 = vcombine.low %v1651_v25, %v1653_v27 }
 0x70f   :  { %v1668_v31 = vrot.slane %v1660_v28, %v2690_v55  ;;  %v1675_v34 = vrot.slane %v1661_v29, %v2690_v55 }
 0x711   :  { %v1676_v35 = vcombine.low %v1668_v31, %v1675_v34 }
 0x713   :  { %v1683_v36 = vrot.slane %v1676_v35, %v2690_v55 }
 0x715   :  { %v1685_v38 = vadd.f32 %v1683_v36, %v1513_v37 }
 0x717   :  { %v2046_v39 = vmul.f32 -1.442695, %v1685_v38  ;;  %v1693_v40 = vrot.slane %v1685_v38, 1  ;;  %v1704_v42 = vrot.slane %v1685_v38, 3  ;;  %v1701_v45 = vrot.slane %v1685_v38, 2 }
 0x719   :  { %2207 = vpow2.f32 %v2046_v39  ;;  %v2047_v41 = vmul.f32 -1.442695, %v1693_v40  ;;  %v2048_v43 = vmul.f32 -1.442695, %v1704_v42 }
 0x71b   :  { %2209 = vpow2.f32 %v2047_v41 }
 0x71c   :  { %2211 = vpow2.f32 %v2048_v43 }
 0x726   :  { %v2208_v44 = vpop.eup %2207 }
 0x727   :  { %v1689_v46 = vadd.f32 1.0, %v2208_v44 }
 0x728   :  { %v2210_v47 = vpop.eup %2209 }
 0x729   :  { %2213 = vrcp.f32 %v1689_v46  ;;  %v1698_v48 = vadd.f32 1.0, %v2210_v47  ;;  %v2212_v49 = vpop.eup %2211 }
 0x72a   :  { %2215 = vtanh.f32 %v1701_v45  ;;  %v1709_v53 = vadd.f32 1.0, %v2212_v49  ;;  %v1938_v45 = vld [vmem:[%s3342_s5] sm:$0x1] }
 0x72b   :  { %2217 = vrcp.f32 %v1698_v48 }
 0x72c   :  { %2219 = vrcp.f32 %v1709_v53 }
 0x736   :  { %v2214_v32 = vpop.eup %2213 }
 0x737   :  { %v2216_v2 = vpop.eup %2215 }
 0x738   :  { %v2218_v51 = vpop.eup %2217  ;;  %v1713_v1 = vmul.f32 %v2216_v2, %v2214_v32 }
 0x739   :  { %v1712_v7 = vmul.f32 %v2218_v51, %v3188_v33  ;;  %v2220_v57 = vpop.eup %2219  ;;  %v1931_v33 = vld [vmem:[%s3341_s4 + $0x48] sm:$0xff] }
 0x73b   :  { %v3260_v4 = vadd.f32 %v1713_v1, %v1712_v7 }
 0x73d   :  { %2221 = vtanh.f32 %v3260_v4 }
 0x74a   :  { %v2222_v0 = vpop.eup %2221 }
 0x74b   :  { %v1716_v8 = vmul.f32 %v2222_v0, %v2220_v57 }
 0x74d   :  { %1784 = vmatmul.mubr.f32.vlgmr.msra.gmra.mxu0 %v1716_v8  ;;  %1855 = vmatmul.mubr.f32.vlgmr.msra.gmra.mxu1 %v1716_v8 }
 0x74e   :  { %2070 = vmatpush3.msra.mxu0 %v1937_v10  ;;  %2101 = vmatprep.mubr.msk.f32.mxu0 %vm2352_vm1, %v3589_v22 }
 0x74f   :  { %2071 = vmatprep.subr.mxu0 %v3589_v22 }
 0x750   :  { %2072 = vmatpush3.msra.mxu0 %v1936_v30 }
 0x751   :  { %2073 = vmatprep.subr.mxu0 %v3589_v22 }
 0x752   :  { %2074 = vmatpush3.msra.mxu0 %v1935_v62 }
 0x753   :  { %2075 = vmatprep.subr.mxu0 %v3589_v22 }
 0x754   :  { %2076 = vmatpush3.msra.mxu0 %v1934_v5 }
 0x755   :  { %2077 = vmatprep.subr.mxu0 %v3589_v22 }
 0x756   :  { %2078 = vmatpush3.msra.mxu0 %v1933_v61 }
 0x757   :  { %2079 = vmatprep.subr.mxu0 %v3589_v22 }
 0x758   :  { %2080 = vmatpush3.msra.mxu0 %v1932_v54 }
 0x759   :  { %2081 = vmatprep.subr.mxu0 %v3589_v22 }
 0x75a   :  { %2082 = vmatpush3.msra.mxu0 %v1931_v33 }
 0x75b   :  { %2083 = vmatprep.subr.mxu0 %v3589_v22 }
 0x75c   :  { %2084 = vmatpush3.msra.mxu0 %v1930_v50 }
 0x75d   :  { %2085 = vmatprep.subr.mxu0 %v3589_v22 }
 0x75e   :  { %2086 = vmatpush3.msra.mxu0 %v1929_v6 }
 0x75f   :  { %2087 = vmatprep.subr.mxu0 %v3589_v22 }
 0x760   :  { %2088 = vmatpush3.msra.mxu0 %v1928_v63 }
 0x761   :  { %2089 = vmatprep.subr.mxu0 %v3589_v22 }
 0x762   :  { %2090 = vmatpush3.msra.mxu0 %v1927_v58 }
 0x763   :  { %2091 = vmatprep.subr.mxu0 %v3589_v22 }
 0x764   :  { %2092 = vmatpush3.msra.mxu0 %v1926_v52 }
 0x765   :  { %2093 = vmatprep.subr.mxu0 %v3589_v22 }
 0x766   :  { %2094 = vmatpush3.msra.mxu0 %v1925_v3 }
 0x767   :  { %2095 = vmatprep.subr.mxu0 %v3589_v22 }
 0x768   :  { %2096 = vmatpush3.msra.mxu0 %v1924_v14 }
 0x769   :  { %2097 = vmatprep.subr.mxu0 %v3589_v22 }
 0x76a   :  { %2098 = vmatpush3.msra.mxu0 %v1923_v59 }
 0x76b   :  { %2099 = vmatprep.subr.mxu0 %v3589_v22 }
 0x76c   :  { %2100 = vmatpush3.msra.mxu0 %v1922_v56 }
 0x80d   :  { %v1785_v60 = vpop.f32.mrf.mxu0  ;;  %v1856_v12 = vpop.f32.mrf.mxu1 }
 0x80f   :  { %v1787_v9 = vpop.f32.mrf.mxu0  ;;  %v1858_v11 = vpop.f32.mrf.mxu1 }
 0x810   :  { %v1865_v13 = vcombine.low %v1785_v60, %v1787_v9  ;;  %v1866_v15 = vcombine.low %v1856_v12, %v1858_v11 }
 0x812   :  { %v1873_v16 = vrot.slane %v1865_v13, %v2690_v55  ;;  %v1880_v17 = vrot.slane %v1866_v15, %v2690_v55 }
 0x814   :  { %v1881_v18 = vcombine.low %v1873_v16, %v1880_v17 }
 0x816   :  { %v1888_v19 = vrot.slane %v1881_v18, %v2690_v55 }
 0x818   :  { %v1890_v21 = vadd.f32 %v1888_v19, %v1718_v20 }
 0x81a   :  { %v2049_v23 = vmul.f32 -1.442695, %v1890_v21  ;;  %v1898_v24 = vrot.slane %v1890_v21, 1  ;;  %v1909_v25 = vrot.slane %v1890_v21, 3  ;;  %v1906_v28 = vrot.slane %v1890_v21, 2 }
 0x81c   :  { %2223 = vpow2.f32 %v2049_v23  ;;  %v2050_v22 = vmul.f32 -1.442695, %v1898_v24  ;;  %v2051_v26 = vmul.f32 -1.442695, %v1909_v25 }
 0x81e   :  { %2225 = vpow2.f32 %v2050_v22 }
 0x81f   :  { %2227 = vpow2.f32 %v2051_v26 }
 0x829   :  { %v2224_v27 = vpop.eup %2223 }
 0x82a   :  { %v1894_v29 = vadd.f32 1.0, %v2224_v27 }
 0x82b   :  { %v2226_v31 = vpop.eup %2225 }
 0x82c   :  { %2229 = vrcp.f32 %v1894_v29  ;;  %v1903_v34 = vadd.f32 1.0, %v2226_v31  ;;  %v2228_v35 = vpop.eup %2227 }
 0x82d   :  { %2231 = vtanh.f32 %v1906_v28  ;;  %v1914_v38 = vadd.f32 1.0, %v2228_v35 }
 0x82e   :  { %2233 = vrcp.f32 %v1903_v34 }
 0x82f   :  { %2235 = vrcp.f32 %v1914_v38 }
 0x839   :  { %v2230_v55 = vpop.eup %2229 }
 0x83a   :  { %v2232_v36 = vpop.eup %2231 }
 0x83b   :  { %v2234_v37 = vpop.eup %2233  ;;  %v1918_v40 = vmul.f32 %v2232_v36, %v2230_v55 }
 0x83c   :  { %v1917_v39 = vmul.f32 %v2234_v37, %v3260_v4  ;;  %v2236_v42 = vpop.eup %2235 }
 0x83e   :  { %v1919_v41 = vadd.f32 %v1918_v40, %v1917_v39 }
 0x840   :  { %2237 = vtanh.f32 %v1919_v41 }
 0x84d   :  { %v2238_v43 = vpop.eup %2237 }
 0x84e   :  { %v1921_v44 = vmul.f32 %v2238_v43, %v2236_v42 }
 0x850   :  { %2102 = vmatmul.mubr.f32.vlgmr.msra.gmra.mxu0 %v1921_v44 }
 0x910   :  { %v2005_v46 = vpop.f32.mrf.mxu0 }
 0x911   :  { %v2006_v47 = vadd.f32 %v2005_v46, %v1938_v45 }
 0x912   :  { %v2103_v48 = vpop.f32.mrf.mxu0 }
 0x913   :  { %2010 = vst.msk [vmem:[#allocation6] sm:$0x1] %vm2009_vm2, %v2006_v47 }
 0x914   :  { %2334 = shalt.err (!%p2331_p9)
}
 0x915   :  { %2020 = dma.vmem_to_hbm [thread:$0]  %s2018_s26, 16, %s3343_s6, [#allocation5]  }
 0x916   :  { %2345 = dma.done.wait [#allocation5], 16  }
 0x917   :  { %2346 = vsyncadd [#allocation5], 4294967280 }
 0x918   :  { %2024 = vsyncpa [#allocation4], 1 }
 0x919   :  { %2025 = vsyncpa [#allocation5], 1 }

</bundles_post_ra>
